<compile_context>
chip_gen: v5e
topology: v5e:2x2
jax: 0.10.0
libtpu: 0.0.40
codegen_flags: <defaults>
</compile_context>

<pallas_src>
import functools
import math

import jax
import jax.numpy as jnp
from jax.experimental import pallas as pl
from jax.experimental.pallas import tpu as pltpu

LANES = 128


def _round_up(x, m):
    return (x + m - 1) // m * m


def _conv3d_fused_kernel(x_ref, w_ref, b_ref, o_ref, slab_ref, *,
                         offsets, cin, tq, halo):
    """One fused MXU matmul per (batch, q-tile) grid step.

    x_ref    : [1, Cin, Lx]       bf16 halo-padded flattened volume (fetched
                                  once per batch, reused across q-tiles)
    w_ref    : [Cout, k^3*Cin]    bf16 lane-dense fused weight matrix
    b_ref    : [Cout, 1]          f32 bias
    o_ref    : [1, Cout, TQ]      f32 output tile (lane-dense stores)
    slab_ref : [k^3*Cin, TQ]      bf16 VMEM scratch: im2col slab for this tile
    """
    j = pl.program_id(1)
    q0 = pl.multiple_of(j * tq, tq)                  # tile start (128-aligned)

    # Read the haloed window for this tile ONCE (aligned dynamic start), then
    # build the im2col slab from k^3 static lane-shifted slices of it.
    win = x_ref[0, :, pl.ds(q0, tq + halo)]          # [Cin, TQ + halo]
    for t, off in enumerate(offsets):
        slab_ref[t * cin:(t + 1) * cin, :] = win[:, off:off + tq]

    # Single fat matmul: K = k^3*Cin, f32 accumulation inside the MXU.
    acc = jnp.dot(w_ref[...], slab_ref[...],
                  preferred_element_type=jnp.float32)        # [Cout, TQ]
    o_ref[0] = (acc + b_ref[...]).astype(o_ref.dtype)


def conv3d_same(x, weight, bias=None, *, tq=512):
    """Equivalent of nn.Conv3d(Cin, Cout, k, stride=1, padding=(k-1)//2).

    x      : [N, Cin, D, H, W]   (NCDHW, PyTorch layout)
    weight : [Cout, Cin, k, k, k]
    bias   : [Cout] or None
    returns: [N, Cout, Do, Ho, Wo]  (f32)
    """
    N, Cin, D, H, W = x.shape
    Cout, _, k, _, _ = weight.shape
    p = (k - 1) // 2
    Dp, Hp, Wp = D + 2 * p, H + 2 * p, W + 2 * p
    Do, Ho, Wo = Dp - k + 1, Hp - k + 1, Wp - k + 1

    plane = Hp * Wp
    q_valid = Do * plane                              # flat positions we keep
    tq = max(LANES, min(tq, _round_up(q_valid, LANES)))
    n_q = pl.cdiv(q_valid, tq)
    off_max = (k - 1) * (plane + Wp + 1)              # largest tap shift
    halo = _round_up(off_max, LANES)

    # Single pad pass: over-pad the depth so the flattened volume already
    # covers every window the last q-tile reads (Lx >= n_q*tq + halo).
    dp2 = -(-(n_q * tq + halo) // plane)
    lx = dp2 * plane
    x_pad = jnp.pad(x.astype(jnp.bfloat16),
                    ((0, 0), (0, 0), (p, dp2 - D - p), (p, p), (p, p)))
    x_flat = x_pad.reshape(N, Cin, lx)

    # Fused lane-dense weight: column = ((a*k + b)*k + c)*Cin + ci, matching
    # the tap/offset enumeration order and the slab row order.
    k3 = k * k * k
    kfull = k3 * Cin
    w_fused = jnp.transpose(weight, (0, 2, 3, 4, 1)).reshape(Cout, kfull)
    w_fused = w_fused.astype(jnp.bfloat16)
    if bias is None:
        bias = jnp.zeros((Cout,), jnp.float32)
    b2 = bias.astype(jnp.float32).reshape(Cout, 1)

    offsets = tuple(a * plane + b * Wp + c
                    for a in range(k) for b in range(k) for c in range(k))

    kern = functools.partial(_conv3d_fused_kernel, offsets=offsets,
                             cin=Cin, tq=tq, halo=halo)

    flops = 2 * N * n_q * Cout * kfull * tq
    bytes_accessed = (N * Cin * lx * 2 + Cout * kfull * 2 + Cout * 4
                      + N * Cout * n_q * tq * 4)

    z = pl.pallas_call(
        kern,
        out_shape=jax.ShapeDtypeStruct((N, Cout, n_q * tq), jnp.float32),
        grid_spec=pltpu.PrefetchScalarGridSpec(
            num_scalar_prefetch=0,
            grid=(N, n_q),                            # batch x spatial tiles
            in_specs=[
                # Full padded volume per batch; block index is constant in j,
                # so it is DMA'd once per batch and reused across q-tiles.
                pl.BlockSpec((1, Cin, lx), lambda n, j: (n, 0, 0)),
                # Fused weights / bias fetched once (constant index_map).
                pl.BlockSpec((Cout, kfull), lambda n, j: (0, 0)),
                pl.BlockSpec((Cout, 1), lambda n, j: (0, 0)),
            ],
            out_specs=pl.BlockSpec((1, Cout, tq), lambda n, j: (n, 0, j)),
            scratch_shapes=[pltpu.VMEM((kfull, tq), jnp.bfloat16)],
        ),
        compiler_params=pltpu.CompilerParams(
            dimension_semantics=("parallel", "parallel"),   # megacore sharding
            vmem_limit_bytes=48 * 1024 * 1024,
        ),
        cost_estimate=pl.CostEstimate(flops=flops, transcendentals=0,
                                      bytes_accessed=bytes_accessed),
    )(x_flat, w_fused, b2)

    # Crop the h/w halo rows/cols out of the padded-layout flat output.
    y = z[:, :, :q_valid].reshape(N, Cout, Do, Hp, Wp)[:, :, :, :Ho, :Wo]
    return y


def init_single_conv3d_block(key, in_planes, out_planes, kernel_size):
    """PyTorch-default Conv3d init (uniform +-1/sqrt(fan_in)), deterministic."""
    kw, kb = jax.random.split(key)
    fan_in = in_planes * kernel_size ** 3
    bound = 1.0 / math.sqrt(fan_in)
    weight = jax.random.uniform(
        kw, (out_planes, in_planes, kernel_size, kernel_size, kernel_size),
        jnp.float32, -bound, bound)
    bias = jax.random.uniform(kb, (out_planes,), jnp.float32, -bound, bound)
    return {"weight": weight, "bias": bias}


def single_conv3d_block_forward(params, x):
    """Mirrors SingleConv3DBlock.forward (a single 'same' Conv3d)."""
    return conv3d_same(x, params["weight"], params["bias"])


if __name__ == "__main__":
    key = jax.random.PRNGKey(0)
    k_x, k_p = jax.random.split(key)

    # Small shapes consistent with the module: batch=2, in_planes=4,
    # out_planes=8, kernel_size=3, 16^3 volume (NCDHW).
    N, Cin, Cout, S, KSZ = 2, 4, 8, 16, 3
    x = jax.random.normal(k_x, (N, Cin, S, S, S), dtype=jnp.float32)
    params = init_single_conv3d_block(k_p, Cin, Cout, KSZ)

    fwd = jax.jit(single_conv3d_block_forward)
    out = jax.block_until_ready(fwd(params, x))

    assert out.shape == (N, Cout, S, S, S), out.shape
    assert bool(jnp.all(jnp.isfinite(out)))

    # Reference check against XLA's conv (f32, highest precision).  bf16 MXU
    # operands with f32 accumulation -> tolerance a bit looser than pure f32.
    pad = (KSZ - 1) // 2
    ref = jax.lax.conv_general_dilated(
        x, params["weight"], window_strides=(1, 1, 1),
        padding=[(pad, pad)] * 3,
        dimension_numbers=("NCDHW", "OIDHW", "NCDHW"),
        precision=jax.lax.Precision.HIGHEST,
    ) + params["bias"].reshape(1, Cout, 1, 1, 1)
    max_err = float(jnp.max(jnp.abs(out - ref)))
    assert max_err < 3e-2, max_err

    print("KERNEL_OK")
</pallas_src>

<mosaic_0001>
module attributes {stable_mosaic.version = 11 : i64} {
  func.func @_conv3d_fused_kernel(%arg0: i32, %arg1: i32, %arg2: memref<1x4x6480xbf16, #tpu.memory_space<vmem>>, %arg3: memref<8x108xbf16, #tpu.memory_space<vmem>>, %arg4: memref<8x1xf32, #tpu.memory_space<vmem>>, %arg5: memref<1x8x512xf32, #tpu.memory_space<vmem>>, %arg6: memref<108x512xbf16, #tpu.memory_space<vmem>>) attributes {dimension_semantics = [#tpu.dimension_semantics<parallel>, #tpu.dimension_semantics<parallel>], iteration_bounds = array<i64: 2, 11>, scalar_prefetch = 0 : i64, scratch_operands = 1 : i64, tpu.core_type = #tpu.core_type<tc>, window_params = [{transform_indices = @transform_0, window_bounds = array<i64: 1, 4, 6480>}, {pipeline_mode = #tpu.pipeline_mode<synchronous>, transform_indices = @transform_1, window_bounds = array<i64: 8, 108>}, {pipeline_mode = #tpu.pipeline_mode<synchronous>, transform_indices = @transform_2, window_bounds = array<i64: 8, 1>}, {transform_indices = @transform_3, window_bounds = array<i64: 1, 8, 512>}]} {
    %c512_i32 = arith.constant 512 : i32
    %0 = arith.muli %arg1, %c512_i32 : i32
    %1 = tpu.assume_multiple %0, 512 : i32
    %c0 = arith.constant 0 : index
    %c0_0 = arith.constant 0 : index
    %2 = arith.index_cast %1 : i32 to index
    %3 = vector.load %arg2[%c0, %c0_0, %2] : memref<1x4x6480xbf16, #tpu.memory_space<vmem>>, vector<1x4x1280xbf16>
    %4 = vector.shape_cast %3 : vector<1x4x1280xbf16> to vector<4x1280xbf16>
    %5 = vector.extract_strided_slice %4 {offsets = [0, 0], sizes = [4, 512], strides = [1, 1]} : vector<4x1280xbf16> to vector<4x512xbf16>
    %c0_1 = arith.constant 0 : index
    %c0_2 = arith.constant 0 : index
    %6 = vector.load %arg6[%c0_1, %c0_2] : memref<108x512xbf16, #tpu.memory_space<vmem>>, vector<4x512xbf16>
    tpu.vector_store %arg6[%c0_1, %c0_2], %5 {strides = array<i32>} : memref<108x512xbf16, #tpu.memory_space<vmem>>, vector<4x512xbf16>,
    %7 = vector.extract_strided_slice %4 {offsets = [0, 1], sizes = [4, 512], strides = [1, 1]} : vector<4x1280xbf16> to vector<4x512xbf16>
    %c4 = arith.constant 4 : index
    %c0_3 = arith.constant 0 : index
    %8 = vector.load %arg6[%c4, %c0_3] : memref<108x512xbf16, #tpu.memory_space<vmem>>, vector<4x512xbf16>
    tpu.vector_store %arg6[%c4, %c0_3], %7 {strides = array<i32>} : memref<108x512xbf16, #tpu.memory_space<vmem>>, vector<4x512xbf16>,
    %9 = vector.extract_strided_slice %4 {offsets = [0, 2], sizes = [4, 512], strides = [1, 1]} : vector<4x1280xbf16> to vector<4x512xbf16>
    %c8 = arith.constant 8 : index
    %c0_4 = arith.constant 0 : index
    %10 = vector.load %arg6[%c8, %c0_4] : memref<108x512xbf16, #tpu.memory_space<vmem>>, vector<4x512xbf16>
    tpu.vector_store %arg6[%c8, %c0_4], %9 {strides = array<i32>} : memref<108x512xbf16, #tpu.memory_space<vmem>>, vector<4x512xbf16>,
    %11 = vector.extract_strided_slice %4 {offsets = [0, 18], sizes = [4, 512], strides = [1, 1]} : vector<4x1280xbf16> to vector<4x512xbf16>
    %c12 = arith.constant 12 : index
    %c0_5 = arith.constant 0 : index
    %12 = vector.load %arg6[%c12, %c0_5] : memref<108x512xbf16, #tpu.memory_space<vmem>>, vector<4x512xbf16>
    tpu.vector_store %arg6[%c12, %c0_5], %11 {strides = array<i32>} : memref<108x512xbf16, #tpu.memory_space<vmem>>, vector<4x512xbf16>,
    %13 = vector.extract_strided_slice %4 {offsets = [0, 19], sizes = [4, 512], strides = [1, 1]} : vector<4x1280xbf16> to vector<4x512xbf16>
    %c16 = arith.constant 16 : index
    %c0_6 = arith.constant 0 : index
    %14 = vector.load %arg6[%c16, %c0_6] : memref<108x512xbf16, #tpu.memory_space<vmem>>, vector<4x512xbf16>
    tpu.vector_store %arg6[%c16, %c0_6], %13 {strides = array<i32>} : memref<108x512xbf16, #tpu.memory_space<vmem>>, vector<4x512xbf16>,
    %15 = vector.extract_strided_slice %4 {offsets = [0, 20], sizes = [4, 512], strides = [1, 1]} : vector<4x1280xbf16> to vector<4x512xbf16>
    %c20 = arith.constant 20 : index
    %c0_7 = arith.constant 0 : index
    %16 = vector.load %arg6[%c20, %c0_7] : memref<108x512xbf16, #tpu.memory_space<vmem>>, vector<4x512xbf16>
    tpu.vector_store %arg6[%c20, %c0_7], %15 {strides = array<i32>} : memref<108x512xbf16, #tpu.memory_space<vmem>>, vector<4x512xbf16>,
    %17 = vector.extract_strided_slice %4 {offsets = [0, 36], sizes = [4, 512], strides = [1, 1]} : vector<4x1280xbf16> to vector<4x512xbf16>
    %c24 = arith.constant 24 : index
    %c0_8 = arith.constant 0 : index
    %18 = vector.load %arg6[%c24, %c0_8] : memref<108x512xbf16, #tpu.memory_space<vmem>>, vector<4x512xbf16>
    tpu.vector_store %arg6[%c24, %c0_8], %17 {strides = array<i32>} : memref<108x512xbf16, #tpu.memory_space<vmem>>, vector<4x512xbf16>,
    %19 = vector.extract_strided_slice %4 {offsets = [0, 37], sizes = [4, 512], strides = [1, 1]} : vector<4x1280xbf16> to vector<4x512xbf16>
    %c28 = arith.constant 28 : index
    %c0_9 = arith.constant 0 : index
    %20 = vector.load %arg6[%c28, %c0_9] : memref<108x512xbf16, #tpu.memory_space<vmem>>, vector<4x512xbf16>
    tpu.vector_store %arg6[%c28, %c0_9], %19 {strides = array<i32>} : memref<108x512xbf16, #tpu.memory_space<vmem>>, vector<4x512xbf16>,
    %21 = vector.extract_strided_slice %4 {offsets = [0, 38], sizes = [4, 512], strides = [1, 1]} : vector<4x1280xbf16> to vector<4x512xbf16>
    %c32 = arith.constant 32 : index
    %c0_10 = arith.constant 0 : index
    %22 = vector.load %arg6[%c32, %c0_10] : memref<108x512xbf16, #tpu.memory_space<vmem>>, vector<4x512xbf16>
    tpu.vector_store %arg6[%c32, %c0_10], %21 {strides = array<i32>} : memref<108x512xbf16, #tpu.memory_space<vmem>>, vector<4x512xbf16>,
    %23 = vector.extract_strided_slice %4 {offsets = [0, 324], sizes = [4, 512], strides = [1, 1]} : vector<4x1280xbf16> to vector<4x512xbf16>
    %c36 = arith.constant 36 : index
    %c0_11 = arith.constant 0 : index
    %24 = vector.load %arg6[%c36, %c0_11] : memref<108x512xbf16, #tpu.memory_space<vmem>>, vector<4x512xbf16>
    tpu.vector_store %arg6[%c36, %c0_11], %23 {strides = array<i32>} : memref<108x512xbf16, #tpu.memory_space<vmem>>, vector<4x512xbf16>,
    %25 = vector.extract_strided_slice %4 {offsets = [0, 325], sizes = [4, 512], strides = [1, 1]} : vector<4x1280xbf16> to vector<4x512xbf16>
    %c40 = arith.constant 40 : index
    %c0_12 = arith.constant 0 : index
    %26 = vector.load %arg6[%c40, %c0_12] : memref<108x512xbf16, #tpu.memory_space<vmem>>, vector<4x512xbf16>
    tpu.vector_store %arg6[%c40, %c0_12], %25 {strides = array<i32>} : memref<108x512xbf16, #tpu.memory_space<vmem>>, vector<4x512xbf16>,
    %27 = vector.extract_strided_slice %4 {offsets = [0, 326], sizes = [4, 512], strides = [1, 1]} : vector<4x1280xbf16> to vector<4x512xbf16>
    %c44 = arith.constant 44 : index
    %c0_13 = arith.constant 0 : index
    %28 = vector.load %arg6[%c44, %c0_13] : memref<108x512xbf16, #tpu.memory_space<vmem>>, vector<4x512xbf16>
    tpu.vector_store %arg6[%c44, %c0_13], %27 {strides = array<i32>} : memref<108x512xbf16, #tpu.memory_space<vmem>>, vector<4x512xbf16>,
    %29 = vector.extract_strided_slice %4 {offsets = [0, 342], sizes = [4, 512], strides = [1, 1]} : vector<4x1280xbf16> to vector<4x512xbf16>
    %c48 = arith.constant 48 : index
    %c0_14 = arith.constant 0 : index
    %30 = vector.load %arg6[%c48, %c0_14] : memref<108x512xbf16, #tpu.memory_space<vmem>>, vector<4x512xbf16>
    tpu.vector_store %arg6[%c48, %c0_14], %29 {strides = array<i32>} : memref<108x512xbf16, #tpu.memory_space<vmem>>, vector<4x512xbf16>,
    %31 = vector.extract_strided_slice %4 {offsets = [0, 343], sizes = [4, 512], strides = [1, 1]} : vector<4x1280xbf16> to vector<4x512xbf16>
    %c52 = arith.constant 52 : index
    %c0_15 = arith.constant 0 : index
    %32 = vector.load %arg6[%c52, %c0_15] : memref<108x512xbf16, #tpu.memory_space<vmem>>, vector<4x512xbf16>
    tpu.vector_store %arg6[%c52, %c0_15], %31 {strides = array<i32>} : memref<108x512xbf16, #tpu.memory_space<vmem>>, vector<4x512xbf16>,
    %33 = vector.extract_strided_slice %4 {offsets = [0, 344], sizes = [4, 512], strides = [1, 1]} : vector<4x1280xbf16> to vector<4x512xbf16>
    %c56 = arith.constant 56 : index
    %c0_16 = arith.constant 0 : index
    %34 = vector.load %arg6[%c56, %c0_16] : memref<108x512xbf16, #tpu.memory_space<vmem>>, vector<4x512xbf16>
    tpu.vector_store %arg6[%c56, %c0_16], %33 {strides = array<i32>} : memref<108x512xbf16, #tpu.memory_space<vmem>>, vector<4x512xbf16>,
    %35 = vector.extract_strided_slice %4 {offsets = [0, 360], sizes = [4, 512], strides = [1, 1]} : vector<4x1280xbf16> to vector<4x512xbf16>
    %c60 = arith.constant 60 : index
    %c0_17 = arith.constant 0 : index
    %36 = vector.load %arg6[%c60, %c0_17] : memref<108x512xbf16, #tpu.memory_space<vmem>>, vector<4x512xbf16>
    tpu.vector_store %arg6[%c60, %c0_17], %35 {strides = array<i32>} : memref<108x512xbf16, #tpu.memory_space<vmem>>, vector<4x512xbf16>,
    %37 = vector.extract_strided_slice %4 {offsets = [0, 361], sizes = [4, 512], strides = [1, 1]} : vector<4x1280xbf16> to vector<4x512xbf16>
    %c64 = arith.constant 64 : index
    %c0_18 = arith.constant 0 : index
    %38 = vector.load %arg6[%c64, %c0_18] : memref<108x512xbf16, #tpu.memory_space<vmem>>, vector<4x512xbf16>
    tpu.vector_store %arg6[%c64, %c0_18], %37 {strides = array<i32>} : memref<108x512xbf16, #tpu.memory_space<vmem>>, vector<4x512xbf16>,
    %39 = vector.extract_strided_slice %4 {offsets = [0, 362], sizes = [4, 512], strides = [1, 1]} : vector<4x1280xbf16> to vector<4x512xbf16>
    %c68 = arith.constant 68 : index
    %c0_19 = arith.constant 0 : index
    %40 = vector.load %arg6[%c68, %c0_19] : memref<108x512xbf16, #tpu.memory_space<vmem>>, vector<4x512xbf16>
    tpu.vector_store %arg6[%c68, %c0_19], %39 {strides = array<i32>} : memref<108x512xbf16, #tpu.memory_space<vmem>>, vector<4x512xbf16>,
    %41 = vector.extract_strided_slice %4 {offsets = [0, 648], sizes = [4, 512], strides = [1, 1]} : vector<4x1280xbf16> to vector<4x512xbf16>
    %c72 = arith.constant 72 : index
    %c0_20 = arith.constant 0 : index
    %42 = vector.load %arg6[%c72, %c0_20] : memref<108x512xbf16, #tpu.memory_space<vmem>>, vector<4x512xbf16>
    tpu.vector_store %arg6[%c72, %c0_20], %41 {strides = array<i32>} : memref<108x512xbf16, #tpu.memory_space<vmem>>, vector<4x512xbf16>,
    %43 = vector.extract_strided_slice %4 {offsets = [0, 649], sizes = [4, 512], strides = [1, 1]} : vector<4x1280xbf16> to vector<4x512xbf16>
    %c76 = arith.constant 76 : index
    %c0_21 = arith.constant 0 : index
    %44 = vector.load %arg6[%c76, %c0_21] : memref<108x512xbf16, #tpu.memory_space<vmem>>, vector<4x512xbf16>
    tpu.vector_store %arg6[%c76, %c0_21], %43 {strides = array<i32>} : memref<108x512xbf16, #tpu.memory_space<vmem>>, vector<4x512xbf16>,
    %45 = vector.extract_strided_slice %4 {offsets = [0, 650], sizes = [4, 512], strides = [1, 1]} : vector<4x1280xbf16> to vector<4x512xbf16>
    %c80 = arith.constant 80 : index
    %c0_22 = arith.constant 0 : index
    %46 = vector.load %arg6[%c80, %c0_22] : memref<108x512xbf16, #tpu.memory_space<vmem>>, vector<4x512xbf16>
    tpu.vector_store %arg6[%c80, %c0_22], %45 {strides = array<i32>} : memref<108x512xbf16, #tpu.memory_space<vmem>>, vector<4x512xbf16>,
    %47 = vector.extract_strided_slice %4 {offsets = [0, 666], sizes = [4, 512], strides = [1, 1]} : vector<4x1280xbf16> to vector<4x512xbf16>
    %c84 = arith.constant 84 : index
    %c0_23 = arith.constant 0 : index
    %48 = vector.load %arg6[%c84, %c0_23] : memref<108x512xbf16, #tpu.memory_space<vmem>>, vector<4x512xbf16>
    tpu.vector_store %arg6[%c84, %c0_23], %47 {strides = array<i32>} : memref<108x512xbf16, #tpu.memory_space<vmem>>, vector<4x512xbf16>,
    %49 = vector.extract_strided_slice %4 {offsets = [0, 667], sizes = [4, 512], strides = [1, 1]} : vector<4x1280xbf16> to vector<4x512xbf16>
    %c88 = arith.constant 88 : index
    %c0_24 = arith.constant 0 : index
    %50 = vector.load %arg6[%c88, %c0_24] : memref<108x512xbf16, #tpu.memory_space<vmem>>, vector<4x512xbf16>
    tpu.vector_store %arg6[%c88, %c0_24], %49 {strides = array<i32>} : memref<108x512xbf16, #tpu.memory_space<vmem>>, vector<4x512xbf16>,
    %51 = vector.extract_strided_slice %4 {offsets = [0, 668], sizes = [4, 512], strides = [1, 1]} : vector<4x1280xbf16> to vector<4x512xbf16>
    %c92 = arith.constant 92 : index
    %c0_25 = arith.constant 0 : index
    %52 = vector.load %arg6[%c92, %c0_25] : memref<108x512xbf16, #tpu.memory_space<vmem>>, vector<4x512xbf16>
    tpu.vector_store %arg6[%c92, %c0_25], %51 {strides = array<i32>} : memref<108x512xbf16, #tpu.memory_space<vmem>>, vector<4x512xbf16>,
    %53 = vector.extract_strided_slice %4 {offsets = [0, 684], sizes = [4, 512], strides = [1, 1]} : vector<4x1280xbf16> to vector<4x512xbf16>
    %c96 = arith.constant 96 : index
    %c0_26 = arith.constant 0 : index
    %54 = vector.load %arg6[%c96, %c0_26] : memref<108x512xbf16, #tpu.memory_space<vmem>>, vector<4x512xbf16>
    tpu.vector_store %arg6[%c96, %c0_26], %53 {strides = array<i32>} : memref<108x512xbf16, #tpu.memory_space<vmem>>, vector<4x512xbf16>,
    %55 = vector.extract_strided_slice %4 {offsets = [0, 685], sizes = [4, 512], strides = [1, 1]} : vector<4x1280xbf16> to vector<4x512xbf16>
    %c100 = arith.constant 100 : index
    %c0_27 = arith.constant 0 : index
    %56 = vector.load %arg6[%c100, %c0_27] : memref<108x512xbf16, #tpu.memory_space<vmem>>, vector<4x512xbf16>
    tpu.vector_store %arg6[%c100, %c0_27], %55 {strides = array<i32>} : memref<108x512xbf16, #tpu.memory_space<vmem>>, vector<4x512xbf16>,
    %57 = vector.extract_strided_slice %4 {offsets = [0, 686], sizes = [4, 512], strides = [1, 1]} : vector<4x1280xbf16> to vector<4x512xbf16>
    %c104 = arith.constant 104 : index
    %c0_28 = arith.constant 0 : index
    %58 = vector.load %arg6[%c104, %c0_28] : memref<108x512xbf16, #tpu.memory_space<vmem>>, vector<4x512xbf16>
    tpu.vector_store %arg6[%c104, %c0_28], %57 {strides = array<i32>} : memref<108x512xbf16, #tpu.memory_space<vmem>>, vector<4x512xbf16>,
    %c0_29 = arith.constant 0 : index
    %c0_30 = arith.constant 0 : index
    %59 = vector.load %arg3[%c0_29, %c0_30] : memref<8x108xbf16, #tpu.memory_space<vmem>>, vector<8x108xbf16>
    %c0_31 = arith.constant 0 : index
    %c0_32 = arith.constant 0 : index
    %60 = vector.load %arg6[%c0_31, %c0_32] : memref<108x512xbf16, #tpu.memory_space<vmem>>, vector<108x512xbf16>
    %cst = arith.constant dense<0.000000e+00> : vector<8x512xf32>
    %61 = tpu.matmul %59, %60, %cst {dimension_numbers = #tpu.dot_dimension_numbers<[1], [0], [0], [1], [0, 0, 1, 1], [], []>} : vector<8x108xbf16>, vector<108x512xbf16>, vector<8x512xf32> -> vector<8x512xf32>
    %c0_33 = arith.constant 0 : index
    %c0_34 = arith.constant 0 : index
    %62 = vector.load %arg4[%c0_33, %c0_34] : memref<8x1xf32, #tpu.memory_space<vmem>>, vector<8x1xf32>
    %63 = vector.broadcast %62 : vector<8x1xf32> to vector<8x512xf32>
    %64 = arith.addf %61, %63 : vector<8x512xf32>
    %c0_35 = arith.constant 0 : index
    %c0_36 = arith.constant 0 : index
    %c0_37 = arith.constant 0 : index
    %65 = vector.load %arg5[%c0_35, %c0_36, %c0_37] : memref<1x8x512xf32, #tpu.memory_space<vmem>>, vector<1x8x512xf32>
    %66 = vector.shape_cast %65 : vector<1x8x512xf32> to vector<8x512xf32>
    %67 = vector.shape_cast %64 : vector<8x512xf32> to vector<1x8x512xf32>
    tpu.vector_store %arg5[%c0_35, %c0_36, %c0_37], %67 {strides = array<i32>} : memref<1x8x512xf32, #tpu.memory_space<vmem>>, vector<1x8x512xf32>,
    return
  }
  func.func @transform_0(%arg0: i32, %arg1: i32) -> (i32, i32, i32) {
    %c0_i32 = arith.constant 0 : i32
    %c0_i32_0 = arith.constant 0 : i32
    %c0_i32_1 = arith.constant 0 : i32
    return %arg0, %c0_i32, %c0_i32_0 : i32, i32, i32
  }
  func.func @transform_1(%arg0: i32, %arg1: i32) -> (i32, i32) {
    %c0_i32 = arith.constant 0 : i32
    %c0_i32_0 = arith.constant 0 : i32
    %c0_i32_1 = arith.constant 0 : i32
    return %c0_i32, %c0_i32_0 : i32, i32
  }
  func.func @transform_2(%arg0: i32, %arg1: i32) -> (i32, i32) {
    %c0_i32 = arith.constant 0 : i32
    %c0_i32_0 = arith.constant 0 : i32
    %c0_i32_1 = arith.constant 0 : i32
    return %c0_i32, %c0_i32_0 : i32, i32
  }
  func.func @transform_3(%arg0: i32, %arg1: i32) -> (i32, i32, i32) {
    %c0_i32 = arith.constant 0 : i32
    %c0_i32_0 = arith.constant 0 : i32
    return %arg0, %c0_i32, %arg1 : i32, i32, i32
  }
}

</mosaic_0001>

<bundles_post_ra>
// kernel: single_conv3d_block_forward.1
= control target key start
LH: loop header
LB: loop body
LE: loop exit
PB: predicated region body
PF: predicated region fallthrough
CT: control target
= control target key end

     0   :  { %s1572_s12 = smov 0   ;;  %s1574_s13 = smov 0   ;;  %s1948_s0 = inlined_call_operand.vmem [shape: bf16[2,4,6480], index: 0, kind: input, shape index: {}]   ;;  %s1949_s1 = inlined_call_operand.vmem [shape: bf16[8,108], index: 1, kind: input, shape index: {}]   ;;  %s1950_s2 = inlined_call_operand.vmem [shape: f32[8,1], index: 2, kind: input, shape index: {}]   ;;  %s1951_s3 = inlined_call_operand.vmem [shape: f32[2,8,5632], index: 3, kind: output, shape index: {}]  }
   0x1   :  { %s1576_s14 = smov 0   ;;  %s1578_s15 = smov 0  }
   0x2   :  { %s1580_s16 = smov 0  }
   0x3 LB: > { %s22_s17 = sadd.s32 1, %s1515_s14  ;;  %s25_s18 = sadd.s32 1, %s1519_s15  ;;  %s1523_s16 = sphi %s1580_s16, %s13_s16   ;;  %s1519_s15 = sphi %s1578_s15, %s1955_s15   ;;  %s1515_s14 = sphi %s1576_s14, %s1954_s14   ;;  %s1511_s13 = sphi %s1574_s13, %s1953_s13   ;;  %s1507_s12 = sphi %s1572_s12, %s1952_s12  }
   0x4   : > { %p23_p0 = scmp.ge.s32.totalorder %s22_s17, 11  ;;  %p1263_p1 = scmp.ge.s32.totalorder %s1523_s16, 1 }
   0x5   : > { %p151_p2 = scmp.lt.s32.totalorder %s1523_s16, 23 }
   0x6   : > { %s1957_s17 = smov (%p23_p0, %s22_s17), 0  ;;  %s1959_s18 = smov (!%p23_p0, %s25_s18), %s1519_s15 }
   0x7   : > { %p152_p3 = pnand %p1263_p1, %p151_p2  ;;  %p27_p4 = scmp.ge.s32.totalorder %s1959_s18, 2 }
   0x8   : > { %p179_p5 = scmp.lt.s32.totalorder (!%p152_p3), %s1511_s13, 1  ;;  %s1267_s19 = sshll.u32 (!%p152_p3), %s1507_s12, 9 }
   0x9   : > { %s1961_s18 = smov (%p27_p4, %s1959_s18), 0  ;;  %155 = sbr.rel (%p152_p3) target bundleno = 546 (0x222), region = 32 }
   0xa   : > { %s196_s20 = sshra.s32 (!%p152_p3), %s1267_s19, 7  ;;  %s1525_s27 = smov (!%p152_p3), 127  }
   0xb   : > { %s1268_s22 = sshll.u32 (!%p152_p3), %s196_s20, 1  ;;  %s1526_s28 = smov (!%p152_p3), 126  }
   0xc   : > { %s1527_s29 = smov (!%p152_p3), 110   ;;  %s1528_s30 = smov (!%p152_p3), 109  }
   0xd   : > { %s1529_s4 = smov (!%p152_p3), 108   ;;  %s1530_s5 = smov (!%p152_p3), 92  }
   0xe   : > { %s1963_s13 = smov (!%p179_p5, %s1511_s13), 1  ;;  %s1531_s6 = smov 90   ;;  %vm260_vm0 = vcmask 1031168   ;;  %vm231_vm1 = vcmask 1043456   ;;  %vm233_vm2 = vcmask 1039360   ;;  %vm315_vm3 = vcmask 891904  }
   0xf   : > { %s1415_s21 = smul.u32 102, %s1963_s13  ;;  %s1532_s7 = smov 60   ;;  %vm343_vm4 = vcmask 883712   ;;  %vm370_vm5 = vcmask 752640   ;;  %vm425_vm6 = vcmask 736256   ;;  %vm453_vm7 = vcmask 490496  }
  0x10   : > { %s1533_s8 = smov 59   ;;  %s1534_s9 = smov 58   ;;  %vm480_vm8 = vcmask 482304   ;;  %vm508_vm9 = vcmask 474112   ;;  %vm535_vm10 = vcmask 343040   ;;  %vm563_vm11 = vcmask 334848  }
  0x11   : > { %s183_s25 = scalar_lea.vmem %s1948_s0, %s1415_s21  ;;  %s1535_s10 = smov 42   ;;  %vm590_vm12 = vcmask 326656   ;;  %vm618_vm13 = vcmask 195584   ;;  %vm645_vm14 = vcmask 187392   ;;  %vm673_vm15 = vcmask 179200  }
  0x12   : > { %s1611_s26 = scalar_lea.vmem %s183_s25, %s1268_s22  ;;  %s1536_s11 = smov 41  }
  0x13   : > { %v1614_v0 = vld [vmem:[%s1611_s26] sm:$0xff]  ;;  %v1617_v1 = vld [vmem:[%s1611_s26 + $0x8] sm:$0xff]  ;;  %s1537_s19 = smov 40   ;;  %s1538_s20 = smov 24   ;;  %v1697_v60 = vld [vmem:[%s1611_s26 + $0x10] sm:$0xf] }
  0x14   : > { %204 = vst [vmem:[#allocation1] ss:$2 sm:$0xff] %v1614_v0  ;;  %s1539_s21 = smov 23   ;;  %s1540_s22 = smov 22  }
  0x15   : > { %215 = vst [vmem:[#allocation1 + $0x11] ss:$2 sm:$0xff] %v1617_v1  ;;  %s1541_s23 = smov 120   ;;  %s1542_s24 = smov 119  }
  0x16   : > { %s1543_s25 = smov 118   ;;  %s1544_s26 = smov 102  }
  0x1b   : > { %v205_v2 = vld.sshfl [vmem:[#allocation1] sm:$0xff pattern:$0x75643120]  ;;  %v206_v3 = vld.sshfl [vmem:[#allocation1 + $0x8] sm:$0xff pattern:$0x75643120] }
  0x1c   : > { %212 = vst [vmem:[#allocation1 + $0x1] ss:$2 sm:$0xff] %v1614_v0  ;;  %v220_v4 = vld.sshfl [vmem:[#allocation1 + $0x10] sm:$0xff pattern:$0x75643120] }
  0x1d   : > { %209 = vst [vmem:[#allocation2] sm:$0x33] %v205_v2  ;;  %226 = vrot.lane.b32.xlu1 %v220_v4, %s1525_s27 }
  0x1e   : > { %210 = vst [vmem:[#allocation2 + $0x8] sm:$0x33] %v206_v3 }
  0x1f   : > { %243 = vst [vmem:[#allocation1 + $0x10] ss:$2 sm:$0xff] %v1617_v1 }
  0x23   : > { %v216_v5 = vld.sshfl [vmem:[#allocation1] sm:$0xff pattern:$0x75643120]  ;;  %v218_v6 = vld.sshfl [vmem:[#allocation1 + $0x8] sm:$0xff pattern:$0x75643120] }
  0x24   : > { %222 = vrot.lane.b32.xlu0 %v216_v5, %s1525_s27  ;;  %241 = vst [vmem:[#allocation1] ss:$2 sm:$0xff] %v1614_v0 }
  0x26   : > { %v248_v7 = vld.sshfl [vmem:[#allocation1 + $0x10] sm:$0xff pattern:$0x75643120] }
  0x27   : > { %254 = vrot.lane.b32.xlu2 %v248_v7, %s1526_s28  ;;  %271 = vst [vmem:[#allocation1 + $0x11] ss:$2 sm:$0xff] %v1617_v1 }
  0x2b   : > { %v244_v8 = vld.sshfl [vmem:[#allocation1] sm:$0xff pattern:$0x75643120]  ;;  %v246_v9 = vld.sshfl [vmem:[#allocation1 + $0x8] sm:$0xff pattern:$0x75643120] }
  0x2c   : > { %224 = vrot.lane.b32.xlu0 %v218_v6, %s1525_s27  ;;  %250 = vrot.lane.b32.xlu1 %v244_v8, %s1526_s28  ;;  %269 = vst [vmem:[#allocation1 + $0x1] ss:$2 sm:$0xff] %v1614_v0  ;;  %s1545_s27 = smov 101  }
  0x2e   : > { %v1626_v10 = vld.sshfl [vmem:[#allocation1 + $0x10] sm:$0xff pattern:$0x75643120] }
  0x2f   : > { %298 = vst [vmem:[#allocation1 + $0x10] ss:$2 sm:$0xff] %v1617_v1  ;;  %252 = vrot.lane.b32.xlu2 %v246_v9, %s1526_s28  ;;  %s1546_s28 = smov 100  }
  0x33   : > { %v272_v11 = vld.sshfl [vmem:[#allocation1] sm:$0xff pattern:$0x75643120]  ;;  %v1629_v12 = vld.sshfl [vmem:[#allocation1 + $0x8] sm:$0xff pattern:$0x75643120] }
  0x34   : > { %278 = vrot.lane.b32.xlu0 %v272_v11, %s1527_s29  ;;  %296 = vst [vmem:[#allocation1] ss:$2 sm:$0xff] %v1614_v0 }
  0x36   : > { %v303_v13 = vld.sshfl [vmem:[#allocation1 + $0x10] sm:$0xff pattern:$0x75643120] }
  0x37   : > { %309 = vrot.lane.b32.xlu1 %v303_v13, %s1528_s30  ;;  %326 = vst [vmem:[#allocation1 + $0x11] ss:$2 sm:$0xff] %v1617_v1 }
  0x3b   : > { %v301_v14 = vld.sshfl [vmem:[#allocation1 + $0x8] sm:$0xff pattern:$0x75643120]  ;;  %v1635_v15 = vld.sshfl [vmem:[#allocation1] sm:$0xff pattern:$0x75643120] }
  0x3c   : > { %307 = vrot.lane.b32.xlu0 %v301_v14, %s1528_s30  ;;  %324 = vst [vmem:[#allocation1 + $0x1] ss:$2 sm:$0xff] %v1614_v0 }
  0x3e   : > { %v331_v16 = vld.sshfl [vmem:[#allocation1 + $0x10] sm:$0xff pattern:$0x75643120] }
  0x3f   : > { %353 = vst [vmem:[#allocation1 + $0x10] ss:$2 sm:$0xff] %v1617_v1 }
  0x43   : > { %v1640_v17 = vld.sshfl [vmem:[#allocation1] sm:$0xff pattern:$0x75643120]  ;;  %v329_v18 = vld.sshfl [vmem:[#allocation1 + $0x8] sm:$0xff pattern:$0x75643120] }
  0x44   : > { %337 = vrot.lane.b32.xlu0 %v331_v16, %s1529_s4  ;;  %351 = vst [vmem:[#allocation1] ss:$2 sm:$0xff] %v1614_v0  ;;  %335 = vrot.lane.b32.xlu2 %v329_v18, %s1529_s4 }
  0x46   : > { %v358_v19 = vld.sshfl [vmem:[#allocation1 + $0x10] sm:$0xff pattern:$0x75643120] }
  0x47   : > { %381 = vst [vmem:[#allocation1 + $0x11] ss:$2 sm:$0xff] %v1617_v1 }
  0x4b   : > { %v356_v20 = vld.sshfl [vmem:[#allocation1 + $0x8] sm:$0xff pattern:$0x75643120]  ;;  %v1646_v21 = vld.sshfl [vmem:[#allocation1] sm:$0xff pattern:$0x75643120] }
  0x4c   : > { %362 = vrot.lane.b32.xlu1 %v356_v20, %s1530_s5  ;;  %379 = vst [vmem:[#allocation1 + $0x1] ss:$2 sm:$0xff] %v1614_v0  ;;  %364 = vrot.lane.b32.xlu2 %v358_v19, %s1530_s5 }
  0x4e   : > { %v1651_v22 = vld.sshfl [vmem:[#allocation1 + $0x10] sm:$0xff pattern:$0x75643120] }
  0x4f   : > { %408 = vst [vmem:[#allocation1 + $0x10] ss:$2 sm:$0xff] %v1617_v1 }
  0x53   : > { %v1654_v23 = vld.sshfl [vmem:[#allocation1] sm:$0xff pattern:$0x75643120]  ;;  %v1656_v24 = vld.sshfl [vmem:[#allocation1 + $0x8] sm:$0xff pattern:$0x75643120] }
  0x54   : > { %406 = vst [vmem:[#allocation1] ss:$2 sm:$0xff] %v1614_v0 }
  0x56   : > { %v413_v25 = vld.sshfl [vmem:[#allocation1 + $0x10] sm:$0xff pattern:$0x75643120] }
  0x57   : > { %419 = vrot.lane.b32.xlu1 %v413_v25, %s1531_s6  ;;  %436 = vst [vmem:[#allocation1 + $0x11] ss:$2 sm:$0xff] %v1617_v1 }
  0x5b   : > { %v411_v26 = vld.sshfl [vmem:[#allocation1 + $0x8] sm:$0xff pattern:$0x75643120]  ;;  %v1661_v27 = vld.sshfl [vmem:[#allocation1] sm:$0xff pattern:$0x75643120] }
  0x5c   : > { %417 = vrot.lane.b32.xlu0 %v411_v26, %s1531_s6  ;;  %434 = vst [vmem:[#allocation1 + $0x1] ss:$2 sm:$0xff] %v1614_v0 }
  0x5e   : > { %v439_v28 = vld.sshfl [vmem:[#allocation1 + $0x10] sm:$0xff pattern:$0x75643120]  ;;  %v441_v29 = vld.sshfl [vmem:[#allocation1 + $0x18] sm:$0xff pattern:$0x75643120] }
  0x5f   : > { %463 = vst [vmem:[#allocation1 + $0x10] ss:$2 sm:$0xff] %v1617_v1  ;;  %445 = vrot.lane.b32.xlu2 %v439_v28, %s1532_s7 }
  0x63   : > { %v1667_v30 = vld.sshfl [vmem:[#allocation1 + $0x8] sm:$0xff pattern:$0x75643120] }
  0x64   : > { %461 = vst [vmem:[#allocation1] ss:$2 sm:$0xff] %v1614_v0  ;;  %447 = vrot.lane.b32.xlu0 %v441_v29, %s1532_s7 }
  0x66   : > { %v466_v31 = vld.sshfl [vmem:[#allocation1 + $0x10] sm:$0xff pattern:$0x75643120]  ;;  %v468_v32 = vld.sshfl [vmem:[#allocation1 + $0x18] sm:$0xff pattern:$0x75643120] }
  0x67   : > { %472 = vrot.lane.b32.xlu1 %v466_v31, %s1533_s8  ;;  %491 = vst [vmem:[#allocation1 + $0x11] ss:$2 sm:$0xff] %v1617_v1  ;;  %474 = vrot.lane.b32.xlu2 %v468_v32, %s1533_s8 }
  0x6b   : > { %v1674_v33 = vld.sshfl [vmem:[#allocation1 + $0x8] sm:$0xff pattern:$0x75643120] }
  0x6c   : > { %489 = vst [vmem:[#allocation1 + $0x1] ss:$2 sm:$0xff] %v1614_v0 }
  0x6e   : > { %v496_v34 = vld.sshfl [vmem:[#allocation1 + $0x18] sm:$0xff pattern:$0x75643120]  ;;  %v494_v35 = vld.sshfl [vmem:[#allocation1 + $0x10] sm:$0xff pattern:$0x75643120] }
  0x6f   : > { %502 = vrot.lane.b32.xlu1 %v496_v34, %s1534_s9  ;;  %500 = vrot.lane.b32.xlu0 %v494_v35, %s1534_s9  ;;  %518 = vst [vmem:[#allocation1 + $0x10] ss:$2 sm:$0xff] %v1617_v1 }
  0x73   : > { %v1680_v36 = vld.sshfl [vmem:[#allocation1 + $0x8] sm:$0xff pattern:$0x75643120] }
  0x74   : > { %516 = vst [vmem:[#allocation1] ss:$2 sm:$0xff] %v1614_v0 }
  0x76   : > { %v521_v37 = vld.sshfl [vmem:[#allocation1 + $0x10] sm:$0xff pattern:$0x75643120]  ;;  %v523_v38 = vld.sshfl [vmem:[#allocation1 + $0x18] sm:$0xff pattern:$0x75643120] }
  0x77   : > { %527 = vrot.lane.b32.xlu0 %v521_v37, %s1535_s10  ;;  %546 = vst [vmem:[#allocation1 + $0x11] ss:$2 sm:$0xff] %v1617_v1  ;;  %529 = vrot.lane.b32.xlu1 %v523_v38, %s1535_s10 }
  0x7b   : > { %v519_v39 = vld.sshfl [vmem:[#allocation1 + $0x8] sm:$0xff pattern:$0x75643120] }
  0x7c   : > { %544 = vst [vmem:[#allocation1 + $0x1] ss:$2 sm:$0xff] %v1614_v0 }
  0x7e   : > { %v549_v40 = vld.sshfl [vmem:[#allocation1 + $0x10] sm:$0xff pattern:$0x75643120]  ;;  %v551_v41 = vld.sshfl [vmem:[#allocation1 + $0x18] sm:$0xff pattern:$0x75643120] }
  0x7f   : > { %555 = vrot.lane.b32.xlu2 %v549_v40, %s1536_s11  ;;  %557 = vrot.lane.b32.xlu0 %v551_v41, %s1536_s11  ;;  %573 = vst [vmem:[#allocation1 + $0x10] ss:$2 sm:$0xff] %v1617_v1 }
  0x81   : > { %v255_v45 = vpop.permute.xlu2 %254 }
  0x82   : > { %v258_v49 = vrot.slane %v255_v45, 4 }
  0x83   : > { %v547_v42 = vld.sshfl [vmem:[#allocation1 + $0x8] sm:$0xff pattern:$0x75643120] }
  0x84   : > { %571 = vst [vmem:[#allocation1] ss:$2 sm:$0xff] %v1614_v0 }
  0x86   : > { %v576_v43 = vld.sshfl [vmem:[#allocation1 + $0x10] sm:$0xff pattern:$0x75643120]  ;;  %v578_v44 = vld.sshfl [vmem:[#allocation1 + $0x18] sm:$0xff pattern:$0x75643120] }
  0x87   : > { %582 = vrot.lane.b32.xlu1 %v576_v43, %s1537_s19  ;;  %601 = vst [vmem:[#allocation1 + $0x11] ss:$2 sm:$0xff] %v1617_v1  ;;  %525 = vrot.lane.b32.xlu2 %v519_v39, %s1535_s10  ;;  %s1547_s10 = smov 84  }
  0x88   : > { %553 = vrot.lane.b32.xlu0 %v547_v42, %s1536_s11  ;;  %s1548_s11 = smov 83  }
  0x89   : > { %v253_v50 = vpop.permute.xlu2 %252 }
  0x8a   : > { %v257_v51 = vrot.slane %v253_v50, 4 }
  0x8b   : > { %v574_v46 = vld.sshfl [vmem:[#allocation1 + $0x8] sm:$0xff pattern:$0x75643120] }
  0x8c   : > { %599 = vst [vmem:[#allocation1 + $0x1] ss:$2 sm:$0xff] %v1614_v0  ;;  %v262_v53 = vsel %vm231_vm1, %v257_v51, %v258_v49 }
  0x8d   : > { %v263_v55 = vsel %vm260_vm0, %v253_v50, %v262_v53 }
  0x8e   : > { %v606_v47 = vld.sshfl [vmem:[#allocation1 + $0x18] sm:$0xff pattern:$0x75643120]  ;;  %v604_v48 = vld.sshfl [vmem:[#allocation1 + $0x10] sm:$0xff pattern:$0x75643120] }
  0x8f   : > { %612 = vrot.lane.b32.xlu1 %v606_v47, %s1538_s20  ;;  %584 = vrot.lane.b32.xlu2 %v578_v44, %s1537_s19  ;;  %628 = vst [vmem:[#allocation1 + $0x10] ss:$2 sm:$0xff] %v1617_v1  ;;  %v227_v54 = vpop.permute.xlu1 %226 }
  0x90   : > { %610 = vrot.lane.b32.xlu0 %v604_v48, %s1538_s20  ;;  %267 = vst [vmem:[#allocation2 + $0x18] sm:$0x33] %v263_v55  ;;  %v230_v62 = vrot.slane %v227_v54, 4 }
  0x93   : > { %v602_v52 = vld.sshfl [vmem:[#allocation1 + $0x8] sm:$0xff pattern:$0x75643120] }
  0x94   : > { %626 = vst [vmem:[#allocation1] ss:$2 sm:$0xff] %v1614_v0 }
  0x96   : > { %v631_v56 = vld.sshfl [vmem:[#allocation1 + $0x10] sm:$0xff pattern:$0x75643120]  ;;  %v633_v57 = vld.sshfl [vmem:[#allocation1 + $0x18] sm:$0xff pattern:$0x75643120]  ;;  %v223_v58 = vpop.permute.xlu0 %222 }
  0x97   : > { %656 = vst [vmem:[#allocation1 + $0x11] ss:$2 sm:$0xff] %v1617_v1  ;;  %580 = vrot.lane.b32.xlu1 %v574_v46, %s1537_s19  ;;  %608 = vrot.lane.b32.xlu2 %v602_v52, %s1538_s20  ;;  %v228_v61 = vrot.slane %v223_v58, 4  ;;  %s1549_s19 = smov 82   ;;  %s1550_s20 = smov 91  }
  0x98   : > { %637 = vrot.lane.b32.xlu0 %v631_v56, %s1539_s21 }
  0x9b   : > { %v629_v59 = vld.sshfl [vmem:[#allocation1 + $0x8] sm:$0xff pattern:$0x75643120] }
  0x9c   : > { %654 = vst [vmem:[#allocation1 + $0x1] ss:$2 sm:$0xff] %v1614_v0 }
  0x9e   : > { %v661_v63 = vld.sshfl [vmem:[#allocation1 + $0x18] sm:$0xff pattern:$0x75643120]  ;;  %v659_v2 = vld.sshfl [vmem:[#allocation1 + $0x10] sm:$0xff pattern:$0x75643120]  ;;  %v225_v3 = vpop.permute.xlu0 %224  ;;  %v251_v4 = vpop.permute.xlu1 %250 }
  0x9f   : > { %639 = vrot.lane.b32.xlu1 %v633_v57, %s1539_s21  ;;  %665 = vrot.lane.b32.xlu2 %v659_v2, %s1540_s22  ;;  %684 = vst [vmem:[#allocation1 + $0x10] ss:$2 sm:$0xff] %v1697_v60  ;;  %v229_v5 = vrot.slane %v225_v3, 4  ;;  %v256_v6 = vrot.slane %v251_v4, 4  ;;  %v1717_v32 = vpop.permute.xlu2 %335 }
  0xa0   : > { %667 = vrot.lane.b32.xlu0 %v661_v63, %s1540_s22  ;;  %v340_v39 = vrot.slane %v1717_v32, 4 }
  0xa1   : > { %v232_v0 = vsel %vm231_vm1, %v228_v61, %v229_v5  ;;  %v235_v7 = vsel %vm231_vm1, %v229_v5, %v230_v62  ;;  %v259_v8 = vsel %vm231_vm1, %v256_v6, %v257_v51 }
  0xa2   : > { %v234_v9 = vsel %vm233_vm2, %v223_v58, %v232_v0  ;;  %v236_v11 = vsel %vm233_vm2, %v225_v3, %v235_v7  ;;  %v261_v14 = vsel %vm260_vm0, %v251_v4, %v259_v8  ;;  %vm701_vm0 = vcmask 982016  }
  0xa3   : > { %v657_v13 = vld.sshfl [vmem:[#allocation1 + $0x8] sm:$0xff pattern:$0x75643120]  ;;  %239 = vst [vmem:[#allocation2] sm:$0xcc] %v234_v9  ;;  %vm729_vm2 = vcmask 973824  }
  0xa4   : > { %681 = vst [vmem:[#allocation1] ss:$2 sm:$0xff] %v1617_v1 }
  0xa5   : > { %240 = vst [vmem:[#allocation2 + $0x8] sm:$0xcc] %v236_v11 }
  0xa6   : > { %v689_v16 = vld.sshfl [vmem:[#allocation1 + $0x10] sm:$0xff pattern:$0x75643120]  ;;  %266 = vst [vmem:[#allocation2 + $0x10] sm:$0x33] %v261_v14  ;;  %v1706_v18 = vpop.permute.xlu0 %278 }
  0xa7   : > { %635 = vrot.lane.b32.xlu2 %v629_v59, %s1539_s21  ;;  %712 = vst [vmem:[#allocation1 + $0x11] ss:$2 sm:$0xff] %v1697_v60  ;;  %v365_v45 = vpop.permute.xlu2 %364 }
  0xa8   : > { %663 = vrot.lane.b32.xlu0 %v657_v13, %s1540_s22  ;;  %v368_v48 = vrot.slane %v365_v45, 4 }
  0xa9   : > { %v310_v25 = vpop.permute.xlu1 %309 }
  0xaa   : > { %v313_v26 = vrot.slane %v310_v25, 4 }
  0xab   : > { %v687_v19 = vld.sshfl [vmem:[#allocation1 + $0x8] sm:$0xff pattern:$0x75643120]  ;;  %v685_v20 = vld.sshfl [vmem:[#allocation1] sm:$0xff pattern:$0x75643120] }
  0xac   : > { %693 = vrot.lane.b32.xlu1 %v687_v19, %s1541_s23  ;;  %710 = vst [vmem:[#allocation1 + $0x1] ss:$2 sm:$0xff] %v1617_v1 }
  0xae   : > { %v717_v28 = vld.sshfl [vmem:[#allocation1 + $0x10] sm:$0xff pattern:$0x75643120]  ;;  %v1712_v29 = vpop.permute.xlu0 %307 }
  0xaf   : > { %695 = vrot.lane.b32.xlu2 %v689_v16, %s1541_s23  ;;  %739 = vst [vmem:[#allocation1 + $0x10] ss:$2 sm:$0xff] %v1697_v60  ;;  %v312_v31 = vrot.slane %v1712_v29, 4 }
  0xb1   : > { %v317_v34 = vsel %vm231_vm1, %v312_v31, %v313_v26 }
  0xb2   : > { %v318_v35 = vsel %vm315_vm3, %v1712_v29, %v317_v34 }
  0xb3   : > { %v715_v37 = vld.sshfl [vmem:[#allocation1 + $0x8] sm:$0xff pattern:$0x75643120]  ;;  %v713_v38 = vld.sshfl [vmem:[#allocation1] sm:$0xff pattern:$0x75643120] }
  0xb4   : > { %723 = vrot.lane.b32.xlu1 %v717_v28, %s1542_s24  ;;  %721 = vrot.lane.b32.xlu0 %v715_v37, %s1542_s24  ;;  %737 = vst [vmem:[#allocation1] ss:$2 sm:$0xff] %v1617_v1 }
  0xb5   : > { %322 = vst [vmem:[#allocation2 + $0x28] sm:$0x33] %v318_v35 }
  0xb6   : > { %v744_v40 = vld.sshfl [vmem:[#allocation1 + $0x10] sm:$0xff pattern:$0x75643120]  ;;  %v338_v41 = vpop.permute.xlu0 %337 }
  0xb7   : > { %750 = vrot.lane.b32.xlu2 %v744_v40, %s1543_s25  ;;  %767 = vst [vmem:[#allocation1 + $0x11] ss:$2 sm:$0xff] %v1697_v60  ;;  %v341_v42 = vrot.slane %v338_v41, 4 }
  0xb9   : > { %v345_v43 = vsel %vm231_vm1, %v340_v39, %v341_v42  ;;  %v1746_v56 = vpop.permute.xlu2 %445 }
  0xba   : > { %v346_v44 = vsel %vm343_vm4, %v1717_v32, %v345_v43  ;;  %v450_v8 = vrot.slane %v1746_v56, 4 }
  0xbb   : > { %v742_v46 = vld.sshfl [vmem:[#allocation1 + $0x8] sm:$0xff pattern:$0x75643120]  ;;  %v740_v47 = vld.sshfl [vmem:[#allocation1] sm:$0xff pattern:$0x75643120] }
  0xbc   : > { %691 = vrot.lane.b32.xlu1 %v685_v20, %s1541_s23  ;;  %765 = vst [vmem:[#allocation1 + $0x1] ss:$2 sm:$0xff] %v1617_v1 }
  0xbd   : > { %350 = vst [vmem:[#allocation2 + $0x28] sm:$0xcc] %v346_v44 }
  0xbe   : > { %v1735_v49 = vpop.permute.xlu1 %362  ;;  %v772_v50 = vld.sshfl [vmem:[#allocation1 + $0x10] sm:$0xff pattern:$0x75643120] }
  0xbf   : > { %719 = vrot.lane.b32.xlu2 %v713_v38, %s1542_s24  ;;  %v367_v51 = vrot.slane %v1735_v49, 4  ;;  %794 = vst [vmem:[#allocation1 + $0x10] ss:$2 sm:$0xff] %v1697_v60 }
  0xc1   : > { %v372_v52 = vsel %vm231_vm1, %v367_v51, %v368_v48  ;;  %v475_v3 = vpop.permute.xlu2 %474 }
  0xc2   : > { %v373_v53 = vsel %vm370_vm5, %v1735_v49, %v372_v52  ;;  %v478_v14 = vrot.slane %v475_v3, 4  ;;  %v929_v49 = vld [vmem:[%s1949_s1] sm:$0xf] }
  0xc3   : > { %v770_v54 = vld.sshfl [vmem:[#allocation1 + $0x8] sm:$0xff pattern:$0x75643120]  ;;  %v768_v55 = vld.sshfl [vmem:[#allocation1] sm:$0xff pattern:$0x75643120] }
  0xc4   : > { %748 = vrot.lane.b32.xlu1 %v742_v46, %s1543_s25  ;;  %776 = vrot.lane.b32.xlu0 %v770_v54, %s1544_s26  ;;  %792 = vst [vmem:[#allocation1] ss:$2 sm:$0xff] %v1617_v1 }
  0xc5   : > { %377 = vst [vmem:[#allocation2 + $0x38] sm:$0x33] %v373_v53 }
  0xc6   : > { %v799_v57 = vld.sshfl [vmem:[#allocation1 + $0x10] sm:$0xff pattern:$0x75643120] }
  0xc7   : > { %746 = vrot.lane.b32.xlu2 %v740_v47, %s1543_s25  ;;  %822 = vst [vmem:[#allocation1 + $0x11] ss:$2 sm:$0xff] %v1697_v60 }
  0xc9   : > { %v420_v61 = vpop.permute.xlu1 %419 }
  0xca   : > { %v423_v62 = vrot.slane %v420_v61, 4 }
  0xcb   : > { %v797_v58 = vld.sshfl [vmem:[#allocation1 + $0x8] sm:$0xff pattern:$0x75643120]  ;;  %v795_v59 = vld.sshfl [vmem:[#allocation1] sm:$0xff pattern:$0x75643120] }
  0xcc   : > { %778 = vrot.lane.b32.xlu1 %v772_v50, %s1544_s26  ;;  %805 = vrot.lane.b32.xlu0 %v799_v57, %s1545_s27  ;;  %820 = vst [vmem:[#allocation1 + $0x1] ss:$2 sm:$0xff] %v1617_v1 }
  0xce   : > { %v1751_v63 = vpop.permute.xlu0 %417  ;;  %v827_v2 = vld.sshfl [vmem:[#allocation1 + $0x10] sm:$0xff pattern:$0x75643120] }
  0xcf   : > { %803 = vrot.lane.b32.xlu2 %v797_v58, %s1545_s27  ;;  %v422_v4 = vrot.slane %v1751_v63, 4  ;;  %849 = vst [vmem:[#allocation1 + $0x10] ss:$2 sm:$0xff] %v1697_v60 }
  0xd1   : > { %v427_v5 = vsel %vm231_vm1, %v422_v4, %v423_v62 }
  0xd2   : > { %v428_v6 = vsel %vm425_vm6, %v1751_v63, %v427_v5 }
  0xd3   : > { %432 = vst [vmem:[#allocation2 + $0x48] sm:$0x33] %v428_v6  ;;  %v825_v0 = vld.sshfl [vmem:[#allocation1 + $0x8] sm:$0xff pattern:$0x75643120] }
  0xd4   : > { %774 = vrot.lane.b32.xlu0 %v768_v55, %s1544_s26  ;;  %801 = vrot.lane.b32.xlu1 %v795_v59, %s1545_s27  ;;  %v823_v7 = vld.sshfl [vmem:[#allocation1] sm:$0xff pattern:$0x75643120] }
  0xd5   : > { %847 = vst [vmem:[#allocation1] ss:$2 sm:$0xff] %v1617_v1 }
  0xd6   : > { %v448_v9 = vpop.permute.xlu0 %447  ;;  %v854_v11 = vld.sshfl [vmem:[#allocation1 + $0x10] sm:$0xff pattern:$0x75643120] }
  0xd7   : > { %833 = vrot.lane.b32.xlu2 %v827_v2, %s1546_s28  ;;  %v451_v13 = vrot.slane %v448_v9, 4  ;;  %877 = vst [vmem:[#allocation1 + $0x11] ss:$2 sm:$0xff] %v1697_v60 }
  0xd9   : > { %v1764_v16 = vpop.permute.xlu2 %555  ;;  %v1766_v19 = vpop.permute.xlu1 %472  ;;  %v455_v20 = vsel %vm231_vm1, %v450_v8, %v451_v13 }
  0xda   : > { %v477_v25 = vrot.slane %v1766_v19, 4  ;;  %v456_v26 = vsel %vm453_vm7, %v1746_v56, %v455_v20  ;;  %v560_v62 = vrot.slane %v1764_v16, 4 }
  0xdb   : > { %460 = vst [vmem:[#allocation2 + $0x48] sm:$0xcc] %v456_v26 }
  0xdc   : > { %v482_v28 = vsel %vm231_vm1, %v477_v25, %v478_v14  ;;  %831 = vrot.lane.b32.xlu1 %v825_v0, %s1546_s28  ;;  %v850_v34 = vld.sshfl [vmem:[#allocation1] sm:$0xff pattern:$0x75643120]  ;;  %v852_v35 = vld.sshfl [vmem:[#allocation1 + $0x8] sm:$0xff pattern:$0x75643120] }
  0xdd   : > { %v483_v37 = vsel %vm480_vm8, %v1766_v19, %v482_v28  ;;  %856 = vrot.lane.b32.xlu0 %v850_v34, %s1547_s10  ;;  %875 = vst [vmem:[#allocation1 + $0x1] ss:$2 sm:$0xff] %v1617_v1 }
  0xde   : > { %487 = vst [vmem:[#allocation2 + $0x58] sm:$0x33] %v483_v37  ;;  %v882_v38 = vld.sshfl [vmem:[#allocation1 + $0x10] sm:$0xff pattern:$0x75643120] }
  0xdf   : > { %860 = vrot.lane.b32.xlu2 %v854_v11, %s1547_s10  ;;  %904 = vst [vmem:[#allocation1 + $0x10] ss:$2 sm:$0xff] %v1697_v60 }
  0xe1   : > { %v503_v40 = vpop.permute.xlu1 %502  ;;  %v1782_v41 = vpop.permute.xlu0 %500 }
  0xe2   : > { %v506_v42 = vrot.slane %v503_v40, 4  ;;  %v505_v43 = vrot.slane %v1782_v41, 4  ;;  %v526_v44 = vpop.permute.xlu2 %525 }
  0xe3   : > { %v531_v60 = vrot.slane %v526_v44, 4 }
  0xe4   : > { %v510_v45 = vsel %vm231_vm1, %v505_v43, %v506_v42  ;;  %858 = vrot.lane.b32.xlu1 %v852_v35, %s1547_s10  ;;  %v880_v46 = vld.sshfl [vmem:[#allocation1 + $0x8] sm:$0xff pattern:$0x75643120]  ;;  %v878_v47 = vld.sshfl [vmem:[#allocation1] sm:$0xff pattern:$0x75643120] }
  0xe5   : > { %v511_v48 = vsel %vm508_vm9, %v1782_v41, %v510_v45  ;;  %886 = vrot.lane.b32.xlu0 %v880_v46, %s1548_s11  ;;  %902 = vst [vmem:[#allocation1] ss:$2 sm:$0xff] %v1617_v1 }
  0xe6   : > { %515 = vst [vmem:[#allocation2 + $0x58] sm:$0xcc] %v511_v48  ;;  %v909_v55 = vld.sshfl [vmem:[#allocation1 + $0x10] sm:$0xff pattern:$0x75643120] }
  0xe7   : > { %829 = vrot.lane.b32.xlu2 %v823_v7, %s1546_s28 }
  0xe9   : > { %v528_v50 = vpop.permute.xlu0 %527  ;;  %v530_v52 = vpop.permute.xlu1 %529 }
  0xea   : > { %v532_v53 = vrot.slane %v528_v50, 4  ;;  %v585_v54 = vpop.permute.xlu2 %584  ;;  %v533_v57 = vrot.slane %v530_v52, 4 }
  0xeb   : > { %v588_v7 = vrot.slane %v585_v54, 4 }
  0xec   : > { %v534_v58 = vsel %vm231_vm1, %v531_v60, %v532_v53  ;;  %888 = vrot.lane.b32.xlu1 %v882_v38, %s1548_s11  ;;  %v537_v59 = vsel %vm231_vm1, %v532_v53, %v533_v57  ;;  %v907_v0 = vld.sshfl [vmem:[#allocation1 + $0x8] sm:$0xff pattern:$0x75643120]  ;;  %v905_v26 = vld.sshfl [vmem:[#allocation1] sm:$0xff pattern:$0x75643120] }
  0xed   : > { %v536_v61 = vsel %vm535_vm10, %v526_v44, %v534_v58  ;;  %915 = vrot.lane.b32.xlu0 %v909_v55, %s1549_s19  ;;  %v538_v1 = vsel %vm535_vm10, %v528_v50, %v537_v59  ;;  %vm756_vm10 = vcmask 965632  }
  0xee   : > { %541 = vst [vmem:[#allocation2 + $0x60] sm:$0x33] %v536_v61 }
  0xef   : > { %415 = vrot.lane.b32.xlu2 %v1661_v27, %s1531_s6  ;;  %542 = vst [vmem:[#allocation2 + $0x68] sm:$0x33] %v538_v1  ;;  %s1265_s6 = sshll.u32 %s1507_s12, 2 }
  0xf0   : > { %p187_p6 = scmp.lt.s32.totalorder %s1265_s6, 43 }
  0xf1   : > { %v558_v2 = vpop.permute.xlu0 %557 }
  0xf2   : > { %v561_v3 = vrot.slane %v558_v2, 4  ;;  %v609_v5 = vpop.permute.xlu2 %608  ;;  %s1965_s6 = smov (!%p187_p6, %s1265_s6), 43 }
  0xf3   : > { %v614_v34 = vrot.slane %v609_v5, 4 }
  0xf4   : > { %v565_v6 = vsel %vm231_vm1, %v560_v62, %v561_v3  ;;  %392 = vrot.lane.b32.xlu1 %v1651_v22, %s1550_s20 }
  0xf5   : > { %390 = vrot.lane.b32.xlu0 %v1656_v24, %s1550_s20  ;;  %v566_v27 = vsel %vm563_vm11, %v1764_v16, %v565_v6 }
  0xf6   : > { %570 = vst [vmem:[#allocation2 + $0x68] sm:$0xcc] %v566_v27 }
  0xf7   : > { %913 = vrot.lane.b32.xlu2 %v907_v0, %s1549_s19 }
  0xf9   : > { %v583_v9 = vpop.permute.xlu1 %582 }
  0xfa   : > { %v587_v11 = vrot.slane %v583_v9, 4  ;;  %v554_v13 = vpop.permute.xlu0 %553  ;;  %v1808_v14 = vpop.permute.xlu2 %665 }
  0xfb   : > { %v559_v20 = vrot.slane %v554_v13, 4  ;;  %v670_v55 = vrot.slane %v1808_v14, 4 }
  0xfc   : > { %v592_v22 = vsel %vm231_vm1, %v587_v11, %v588_v7  ;;  %884 = vrot.lane.b32.xlu1 %v878_v47, %s1548_s11 }
  0xfd   : > { %v593_v24 = vsel %vm590_vm12, %v583_v9, %v592_v22  ;;  %v562_v16 = vsel %vm231_vm1, %v559_v20, %v560_v62  ;;  %443 = vrot.lane.b32.xlu0 %v1667_v30, %s1532_s7  ;;  %s1416_s7 = smul.u32 44, %s1963_s13 }
  0xfe   : > { %597 = vst [vmem:[#allocation2 + $0x78] sm:$0x33] %v593_v24  ;;  %v564_v28 = vsel %vm563_vm11, %v554_v13, %v562_v16  ;;  %vm784_vm11 = vcmask 834560  }
  0xff   : > { %569 = vst [vmem:[#allocation2 + $0x60] sm:$0xcc] %v564_v28  ;;  %911 = vrot.lane.b32.xlu2 %v905_v26, %s1549_s19 }
 0x101   : > { %v613_v35 = vpop.permute.xlu1 %612 }
 0x102   : > { %v616_v37 = vrot.slane %v613_v35, 4  ;;  %v611_v38 = vpop.permute.xlu0 %610  ;;  %v636_v40 = vpop.permute.xlu2 %635 }
 0x103   : > { %v615_v42 = vrot.slane %v611_v38, 4  ;;  %v641_v47 = vrot.slane %v636_v40, 4 }
 0x104   : > { %470 = vrot.lane.b32.xlu1 %v1674_v33, %s1533_s8  ;;  %s190_s8 = sadd.s32 %s1416_s7, %s1965_s6 }
 0x105   : > { %v617_v44 = vsel %vm231_vm1, %v614_v34, %v615_v42  ;;  %v620_v30 = vsel %vm231_vm1, %v615_v42, %v616_v37  ;;  %280 = vrot.lane.b32.xlu0 %v1629_v12, %s1527_s29 }
 0x106   : > { %v619_v45 = vsel %vm618_vm13, %v609_v5, %v617_v44  ;;  %v621_v46 = vsel %vm618_vm13, %v611_v38, %v620_v30  ;;  %vm839_vm13 = vcmask 818176  }
 0x107   : > { %624 = vst [vmem:[#allocation2 + $0x70] sm:$0xcc] %v619_v45  ;;  %498 = vrot.lane.b32.xlu2 %v1680_v36, %s1534_s9  ;;  %s1266_s9 = sshll.u32 %s190_s8, 3 }
 0x108   : > { %625 = vst [vmem:[#allocation2 + $0x78] sm:$0xcc] %v621_v46  ;;  %s192_s23 = scalar_lea.vmem %s1951_s3, %s1266_s9 }
 0x109   : > { %v581_v48 = vpop.permute.xlu1 %580 }
 0x10a   : > { %v638_v60 = vpop.permute.xlu0 %637  ;;  %v586_v50 = vrot.slane %v581_v48, 4  ;;  %v696_v52 = vpop.permute.xlu2 %695 }
 0x10b   : > { %v642_v33 = vrot.slane %v638_v60, 4  ;;  %v699_v6 = vrot.slane %v696_v52, 4 }
 0x10c   : > { %v589_v53 = vsel %vm231_vm1, %v586_v50, %v587_v11  ;;  %282 = vrot.lane.b32.xlu1 %v1626_v10, %s1527_s29 }
 0x10d   : > { %v644_v12 = vsel %vm231_vm1, %v641_v47, %v642_v33  ;;  %v591_v54 = vsel %vm590_vm12, %v581_v48, %v589_v53  ;;  %333 = vrot.lane.b32.xlu0 %v1640_v17, %s1529_s4  ;;  %vm811_vm12 = vcmask 826368  }
 0x10e   : > { %v646_v36 = vsel %vm645_vm14, %v636_v40, %v644_v12  ;;  %596 = vst [vmem:[#allocation2 + $0x70] sm:$0x33] %v591_v54 }
 0x10f   : > { %651 = vst [vmem:[#allocation2 + $0x80] sm:$0x33] %v646_v36  ;;  %305 = vrot.lane.b32.xlu2 %v1635_v15, %s1528_s30 }
 0x111   : > { %v640_v57 = vpop.permute.xlu1 %639 }
 0x112   : > { %v668_v58 = vpop.permute.xlu0 %667  ;;  %v643_v10 = vrot.slane %v640_v57, 4  ;;  %v751_v59 = vpop.permute.xlu2 %750 }
 0x113   : > { %v671_v61 = vrot.slane %v668_v58, 4  ;;  %v754_v47 = vrot.slane %v751_v59, 4 }
 0x114   : > { %v647_v1 = vsel %vm231_vm1, %v642_v33, %v643_v10  ;;  %360 = vrot.lane.b32.xlu1 %v1646_v21, %s1530_s5 }
 0x115   : > { %v675_v17 = vsel %vm231_vm1, %v670_v55, %v671_v61  ;;  %v648_v62 = vsel %vm645_vm14, %v638_v60, %v647_v1  ;;  %vm866_vm14 = vcmask 687104  }
 0x116   : > { %652 = vst [vmem:[#allocation2 + $0x88] sm:$0x33] %v648_v62  ;;  %v676_v15 = vsel %vm673_vm15, %v1808_v14, %v675_v17 }
 0x117   : > { %388 = vrot.lane.b32.xlu2 %v1654_v23, %s1550_s20  ;;  %680 = vst [vmem:[#allocation2 + $0x88] sm:$0xcc] %v676_v15 }
 0x11a   : > { %v664_v2 = vpop.permute.xlu0 %663  ;;  %v720_v3 = vpop.permute.xlu2 %719 }
 0x11b   : > { %v669_v5 = vrot.slane %v664_v2, 4  ;;  %v725_v14 = vrot.slane %v720_v3, 4 }
 0x11d   : > { %v672_v0 = vsel %vm231_vm1, %v669_v5, %v670_v55 }
 0x11e   : > { %v674_v27 = vsel %vm673_vm15, %v664_v2, %v672_v0  ;;  %v694_v7 = vpop.permute.xlu1 %693  ;;  %vm894_vm15 = vcmask 678912  }
 0x11f   : > { %679 = vst [vmem:[#allocation2 + $0x80] sm:$0xcc] %v674_v27  ;;  %v698_v21 = vrot.slane %v694_v7, 4 }
 0x121   : > { %v703_v9 = vsel %vm231_vm1, %v698_v21, %v699_v6 }
 0x122   : > { %v704_v11 = vsel %vm701_vm0, %v703_v9, %v696_v52  ;;  %v747_v13 = vpop.permute.xlu2 %746 }
 0x123   : > { %708 = vst [vmem:[#allocation2 + $0x98] sm:$0x33] %v704_v11  ;;  %v752_v30 = vrot.slane %v747_v13, 4 }
 0x126   : > { %v724_v23 = vpop.permute.xlu1 %723  ;;  %v722_v20 = vpop.permute.xlu0 %721 }
 0x127   : > { %v727_v22 = vrot.slane %v724_v23, 4  ;;  %v726_v26 = vrot.slane %v722_v20, 4 }
 0x129   : > { %v728_v24 = vsel %vm231_vm1, %v725_v14, %v726_v26  ;;  %v731_v16 = vsel %vm231_vm1, %v726_v26, %v727_v22 }
 0x12a   : > { %v730_v28 = vsel %vm729_vm2, %v728_v24, %v722_v20  ;;  %v732_v34 = vsel %vm729_vm2, %v731_v16, %v724_v23  ;;  %v804_v35 = vpop.permute.xlu2 %803  ;;  %vm1104_vm2 = vcmask 1045504  }
 0x12b   : > { %735 = vst [vmem:[#allocation2 + $0x90] sm:$0xcc] %v730_v28  ;;  %v808_v12 = vrot.slane %v804_v35, 4 }
 0x12c   : > { %736 = vst [vmem:[#allocation2 + $0x98] sm:$0xcc] %v732_v34 }
 0x12e   : > { %v692_v37 = vpop.permute.xlu1 %691 }
 0x12f   : > { %v697_v38 = vrot.slane %v692_v37, 4 }
 0x131   : > { %v700_v40 = vsel %vm231_vm1, %v697_v38, %v698_v21 }
 0x132   : > { %v702_v42 = vsel %vm701_vm0, %v700_v40, %v694_v7  ;;  %v834_v44 = vpop.permute.xlu2 %833  ;;  %vm398_vm0 = vcmask 744448  }
 0x133   : > { %707 = vst [vmem:[#allocation2 + $0x90] sm:$0x33] %v702_v42  ;;  %v837_v23 = vrot.slane %v834_v44, 4 }
 0x136   : > { %v749_v45 = vpop.permute.xlu1 %748  ;;  %v777_v46 = vpop.permute.xlu0 %776 }
 0x137   : > { %v753_v48 = vrot.slane %v749_v45, 4  ;;  %v781_v54 = vrot.slane %v777_v46, 4 }
 0x139   : > { %v755_v60 = vsel %vm231_vm1, %v752_v30, %v753_v48  ;;  %v758_v50 = vsel %vm231_vm1, %v753_v48, %v754_v47 }
 0x13a   : > { %v757_v52 = vsel %vm756_vm10, %v755_v60, %v749_v45  ;;  %v759_v33 = vsel %vm756_vm10, %v758_v50, %v751_v59  ;;  %v861_v53 = vpop.permute.xlu2 %860 }
 0x13b   : > { %762 = vst [vmem:[#allocation2 + $0xa0] sm:$0x33] %v757_v52 }
 0x13c   : > { %763 = vst [vmem:[#allocation2 + $0xa8] sm:$0x33] %v759_v33 }
 0x13e   : > { %v779_v36 = vpop.permute.xlu1 %778  ;;  %v806_v55 = vpop.permute.xlu0 %805 }
 0x13f   : > { %v782_v57 = vrot.slane %v779_v36, 4  ;;  %v809_v58 = vrot.slane %v806_v55, 4 }
 0x141   : > { %v786_v10 = vsel %vm231_vm1, %v781_v54, %v782_v57  ;;  %v813_v61 = vsel %vm231_vm1, %v808_v12, %v809_v58 }
 0x142   : > { %v787_v1 = vsel %vm784_vm11, %v786_v10, %v779_v36  ;;  %v814_v17 = vsel %vm811_vm12, %v813_v61, %v806_v55  ;;  %v830_v59 = vpop.permute.xlu2 %829 }
 0x143   : > { %791 = vst [vmem:[#allocation2 + $0xa8] sm:$0xcc] %v787_v1  ;;  %v835_v9 = vrot.slane %v830_v59, 4 }
 0x144   : > { %818 = vst [vmem:[#allocation2 + $0xb8] sm:$0x33] %v814_v17 }
 0x146   : > { %v775_v62 = vpop.permute.xlu0 %774  ;;  %v802_v15 = vpop.permute.xlu1 %801 }
 0x147   : > { %v780_v2 = vrot.slane %v775_v62, 4  ;;  %v807_v3 = vrot.slane %v802_v15, 4 }
 0x149   : > { %v783_v5 = vsel %vm231_vm1, %v780_v2, %v781_v54  ;;  %v810_v6 = vsel %vm231_vm1, %v807_v3, %v808_v12 }
 0x14a   : > { %v785_v0 = vsel %vm784_vm11, %v783_v5, %v777_v46  ;;  %v812_v27 = vsel %vm811_vm12, %v810_v6, %v804_v35  ;;  %v416_v7 = vpop.permute.xlu2 %415 }
 0x14b   : > { %790 = vst [vmem:[#allocation2 + $0xa0] sm:$0xcc] %v785_v0  ;;  %v421_v21 = vrot.slane %v416_v7, 4 }
 0x14c   : > { %817 = vst [vmem:[#allocation2 + $0xb0] sm:$0x33] %v812_v27 }
 0x14d   : > { %v424_v11 = vsel %vm231_vm1, %v421_v21, %v422_v4  ;;  %v864_v4 = vrot.slane %v861_v53, 4 }
 0x14e   : > { %v426_v13 = vsel %vm425_vm6, %v416_v7, %v424_v11  ;;  %v832_v14 = vpop.permute.xlu1 %831  ;;  %vm921_vm6 = vcmask 670720  }
 0x14f   : > { %431 = vst [vmem:[#allocation2 + $0x40] sm:$0x33] %v426_v13  ;;  %v836_v20 = vrot.slane %v832_v14, 4  ;;  %v857_v22 = vpop.permute.xlu0 %856 }
 0x150   : > { %v862_v63 = vrot.slane %v857_v22, 4 }
 0x151   : > { %v838_v26 = vsel %vm231_vm1, %v835_v9, %v836_v20  ;;  %v841_v24 = vsel %vm231_vm1, %v836_v20, %v837_v23 }
 0x152   : > { %v840_v16 = vsel %vm839_vm13, %v838_v26, %v832_v14  ;;  %v842_v28 = vsel %vm839_vm13, %v841_v24, %v834_v44  ;;  %v914_v34 = vpop.permute.xlu2 %913 }
 0x153   : > { %845 = vst [vmem:[#allocation2 + $0xb0] sm:$0xcc] %v840_v16  ;;  %v918_v47 = vrot.slane %v914_v34, 4 }
 0x154   : > { %846 = vst [vmem:[#allocation2 + $0xb8] sm:$0xcc] %v842_v28  ;;  %v1359_v28 = vld [vmem:[#allocation2 + $0xa8] sm:$0xf] }
 0x156   : > { %v859_v35 = vpop.permute.xlu1 %858 }
 0x157   : > { %v863_v37 = vrot.slane %v859_v35, 4  ;;  %v1868_v38 = vpop.permute.xlu0 %886 }
 0x158   : > { %v891_v48 = vrot.slane %v1868_v38, 4 }
 0x159   : > { %v865_v40 = vsel %vm231_vm1, %v862_v63, %v863_v37  ;;  %v868_v42 = vsel %vm231_vm1, %v863_v37, %v864_v4 }
 0x15a   : > { %v867_v30 = vsel %vm866_vm14, %v865_v40, %v859_v35  ;;  %v869_v45 = vsel %vm866_vm14, %v868_v42, %v861_v53  ;;  %v912_v46 = vpop.permute.xlu2 %911  ;;  %v1406_v40 = vld [vmem:[#allocation2 + $0x94] sm:$0xf0]  ;;  %v1345_v42 = vld [vmem:[#allocation2 + $0x98] sm:$0xf0] }
 0x15b   : > { %872 = vst [vmem:[#allocation2 + $0xc0] sm:$0x33] %v867_v30  ;;  %v917_v44 = vrot.slane %v912_v46, 4  ;;  %v1410_v20 = vld [vmem:[#allocation2 + $0xb4] sm:$0xf0] }
 0x15c   : > { %873 = vst [vmem:[#allocation2 + $0xc8] sm:$0x33] %v869_v45  ;;  %v1361_v22 = vld [vmem:[#allocation2 + $0xb8] sm:$0xf0]  ;;  %v1343_v46 = vld [vmem:[#allocation2 + $0x88] sm:$0xf] }
 0x15d   : > { %v920_v60 = vsel %vm231_vm1, %v917_v44, %v918_v47  ;;  %v1344_v56 = vor.u32 %v1406_v40, %v1343_v46  ;;  %v1403_v46 = vld [vmem:[#allocation2 + $0x84] sm:$0xf] }
 0x15e   : > { %v889_v50 = vpop.permute.xlu1 %888  ;;  %v922_v52 = vsel %vm921_vm6, %v920_v60, %v914_v34  ;;  %v1408_v34 = vld [vmem:[#allocation2 + $0xac] sm:$0xf] }
 0x15f   : > { %v892_v33 = vrot.slane %v889_v50, 4  ;;  %v916_v12 = vpop.permute.xlu0 %915  ;;  %927 = vst [vmem:[#allocation2 + $0xd0] sm:$0x33] %v922_v52  ;;  %v1364_v63 = vor.u32 %v1408_v34, %v1361_v22  ;;  %v284_v52 = vrot.slane %v1706_v18, 4  ;;  %v1351_v22 = vld [vmem:[#allocation2 + $0xa0] sm:$0xf] }
 0x160   : > { %v919_v54 = vrot.slane %v916_v12, 4  ;;  %v1295_v34 = vld [vmem:[#allocation2 + $0x28] sm:$0xf] }
 0x161   : > { %v896_v36 = vsel %vm231_vm1, %v891_v48, %v892_v33 }
 0x162   : > { %v897_v53 = vsel %vm894_vm15, %v896_v36, %v889_v50  ;;  %v923_v55 = vsel %vm231_vm1, %v918_v47, %v919_v54  ;;  %v499_v57 = vpop.permute.xlu2 %498  ;;  %v1404_v47 = vld [vmem:[#allocation2 + $0x8c] sm:$0xf]  ;;  %v1329_v50 = vld [vmem:[#allocation2 + $0x78] sm:$0xf0]  ;;  %v1327_v36 = vld [vmem:[#allocation2 + $0x68] sm:$0xf] }
 0x163   : > { %901 = vst [vmem:[#allocation2 + $0xc8] sm:$0xcc] %v897_v53  ;;  %v924_v58 = vsel %vm921_vm6, %v923_v55, %v916_v12  ;;  %v504_v10 = vrot.slane %v499_v57, 4  ;;  %v1400_v53 = vld [vmem:[#allocation2 + $0x6c] sm:$0xf] }
 0x164   : > { %928 = vst [vmem:[#allocation2 + $0xd8] sm:$0x33] %v924_v58  ;;  %v1332_v58 = vor.u32 %v1400_v53, %v1329_v50 }
 0x165   : > { %v507_v61 = vsel %vm231_vm1, %v504_v10, %v505_v43 }
 0x166   : > { %v509_v1 = vsel %vm508_vm9, %v499_v57, %v507_v61  ;;  %v393_v17 = vpop.permute.xlu1 %392  ;;  %v1413_v10 = vld [vmem:[#allocation2 + $0xcc] sm:$0x30]  ;;  %v1398_v61 = vld [vmem:[#allocation2 + $0x54] sm:$0xf0] }
 0x167   : > { %514 = vst [vmem:[#allocation2 + $0x50] sm:$0xcc] %v509_v1  ;;  %v396_v59 = vrot.slane %v393_v17, 4  ;;  %v391_v62 = vpop.permute.xlu0 %390  ;;  %v1313_v1 = vld [vmem:[#allocation2 + $0x58] sm:$0xf0] }
 0x168   : > { %v395_v15 = vrot.slane %v391_v62, 4 }
 0x16a   : > { %v400_v2 = vsel %vm231_vm1, %v395_v15, %v396_v59  ;;  %v306_v3 = vpop.permute.xlu2 %305  ;;  %v1375_v5 = vld [vmem:[#allocation2 + $0xc8] sm:$0xf]  ;;  %v1412_v6 = vld [vmem:[#allocation2 + $0xcc] sm:$0xf] }
 0x16b   : > { %v401_v0 = vsel %vm398_vm0, %v391_v62, %v400_v2  ;;  %v311_v27 = vrot.slane %v306_v3, 4  ;;  %v1414_v7 = vld [vmem:[#allocation2 + $0xd4] sm:$0x30]  ;;  %v1377_v41 = vld [vmem:[#allocation2 + $0xd8] sm:$0x30] }
 0x16c   : > { %405 = vst [vmem:[#allocation2 + $0x38] sm:$0xcc] %v401_v0  ;;  %v1376_v43 = vor.u32 %v1414_v7, %v1375_v5  ;;  %v1380_v21 = vor.u32 %v1412_v6, %v1377_v41  ;;  %v1369_v2 = vld [vmem:[#allocation2 + $0xd0] sm:$0x30]  ;;  %v1311_v5 = vld [vmem:[#allocation2 + $0x48] sm:$0xf] }
 0x16d   : > { %v314_v9 = vsel %vm231_vm1, %v311_v27, %v312_v31  ;;  %v1360_v31 = vor.u32 %v1410_v20, %v1359_v28  ;;  %v1396_v6 = vld [vmem:[#allocation2 + $0x4c] sm:$0xf]  ;;  %v1409_v0 = vld [vmem:[#allocation2 + $0xac] sm:$0xf0]  ;;  %v1312_v41 = vor.u32 %v1398_v61, %v1311_v5 }
 0x16e   : > { %v316_v11 = vsel %vm315_vm3, %v306_v3, %v314_v9  ;;  %v885_v13 = vpop.permute.xlu1 %884  ;;  %v1112_v14 = vsel %vm1104_vm2, %v1376_v43, 0  ;;  %v1115_v23 = vsel %vm1104_vm2, %v1380_v21, 0  ;;  %vm288_vm3 = vcmask 900096   ;;  %v1353_v21 = vld [vmem:[#allocation2 + $0xb0] sm:$0xf0] }
 0x16f   : > { %321 = vst [vmem:[#allocation2 + $0x20] sm:$0x33] %v316_v11  ;;  %v444_v26 = vpop.permute.xlu0 %443  ;;  %v890_v24 = vrot.slane %v885_v13, 4  ;;  %1144 = vmatpush.bf16.msra.mxu2 %v1112_v14  ;;  %1157 = vmatpush.bf16.msra.mxu3 %v1115_v23  ;;  %v1316_v43 = vor.u32 %v1396_v6, %v1313_v1  ;;  %v1551_v9 = vmov 0   ;;  %v1271_v6 = vld [vmem:[#allocation2] sm:$0xf] }
 0x170   : > { %v449_v16 = vrot.slane %v444_v26, 4  ;;  %1484 = vset.pattern.permute.xlu0 %v1551_v9 }
 0x171   : > { %v893_v29 = vsel %vm231_vm1, %v890_v24, %v891_v48  ;;  %v1348_v48 = vor.u32 %v1404_v47, %v1345_v42 }
 0x172   : > { %v452_v35 = vsel %vm231_vm1, %v449_v16, %v450_v8  ;;  %v895_v4 = vsel %vm894_vm15, %v893_v29, %v1868_v38  ;;  %v389_v37 = vpop.permute.xlu2 %388  ;;  %v1402_v38 = vld [vmem:[#allocation2 + $0x74] sm:$0xf0]  ;;  %v1352_v16 = vor.u32 %v1409_v0, %v1351_v22  ;;  %v1392_v29 = vld [vmem:[#allocation2 + $0x2c] sm:$0xf]  ;;  %v1387_v0 = vld [vmem:[#allocation2 + $0x4] sm:$0xf] }
 0x173   : > { %v454_v30 = vsel %vm453_vm7, %v444_v26, %v452_v35  ;;  %900 = vst [vmem:[#allocation2 + $0xc0] sm:$0xcc] %v895_v4  ;;  %v394_v45 = vrot.slane %v389_v37, 4  ;;  %1145 = vmatpush.bf16.msra.mxu2 %v1360_v31  ;;  %1158 = vmatpush.bf16.msra.mxu3 %v1364_v63  ;;  %v1328_v57 = vor.u32 %v1402_v38, %v1327_v36  ;;  %v1394_v13 = vld [vmem:[#allocation2 + $0x34] sm:$0xf0] }
 0x174   : > { %459 = vst [vmem:[#allocation2 + $0x40] sm:$0xcc] %v454_v30  ;;  %v1297_v14 = vld [vmem:[#allocation2 + $0x38] sm:$0xf0]  ;;  %v1407_v26 = vld [vmem:[#allocation2 + $0xa4] sm:$0xf]  ;;  %v1296_v63 = vor.u32 %v1394_v13, %v1295_v34 }
 0x175   : > { %v397_v44 = vsel %vm231_vm1, %v394_v45, %v395_v15  ;;  %v1356_v28 = vor.u32 %v1407_v26, %v1353_v21  ;;  %v1300_v35 = vor.u32 %v1392_v29, %v1297_v14  ;;  %v1405_v4 = vld [vmem:[#allocation2 + $0x8c] sm:$0xf0]  ;;  %v1335_v45 = vld [vmem:[#allocation2 + $0x80] sm:$0xf] }
 0x176   : > { %v399_v8 = vsel %vm398_vm0, %v389_v37, %v397_v44  ;;  %v471_v60 = vpop.permute.xlu1 %470  ;;  %v1337_v37 = vld [vmem:[#allocation2 + $0x90] sm:$0xf0]  ;;  %v1336_v47 = vor.u32 %v1405_v4, %v1335_v45 }
 0x177   : > { %404 = vst [vmem:[#allocation2 + $0x30] sm:$0xcc] %v399_v8  ;;  %v281_v33 = vpop.permute.xlu0 %280  ;;  %v476_v12 = vrot.slane %v471_v60, 4  ;;  %1146 = vmatpush.bf16.msra.mxu2 %v1344_v56  ;;  %1159 = vmatpush.bf16.msra.mxu3 %v1348_v48  ;;  %v1340_v44 = vor.u32 %v1403_v46, %v1337_v37  ;;  %v1401_v56 = vld [vmem:[#allocation2 + $0x6c] sm:$0xf0] }
 0x178   : > { %v285_v54 = vrot.slane %v281_v33, 4  ;;  %v1321_v48 = vld [vmem:[#allocation2 + $0x70] sm:$0xf0] }
 0x179   : > { %v479_v55 = vsel %vm231_vm1, %v476_v12, %v477_v25 }
 0x17a   : > { %v287_v17 = vsel %vm231_vm1, %v284_v52, %v285_v54  ;;  %v481_v59 = vsel %vm480_vm8, %v471_v60, %v479_v55  ;;  %v1367_v62 = vld [vmem:[#allocation2 + $0xc0] sm:$0xf]  ;;  %v1411_v15 = vld [vmem:[#allocation2 + $0xc4] sm:$0xf]  ;;  %v1388_v55 = vld [vmem:[#allocation2 + $0xc] sm:$0xf] }
 0x17b   : > { %v289_v3 = vsel %vm288_vm3, %v1706_v18, %v287_v17  ;;  %486 = vst [vmem:[#allocation2 + $0x50] sm:$0x33] %v481_v59  ;;  %1147 = vmatpush.bf16.msra.mxu2 %v1328_v57  ;;  %1160 = vmatpush.bf16.msra.mxu3 %v1332_v58  ;;  %v1368_v19 = vor.u32 %v1413_v10, %v1367_v62  ;;  %v958_v18 = vld [vmem:[%s1950_s2] sm:$0xff]  ;;  %v1399_v60 = vld [vmem:[#allocation2 + $0x64] sm:$0xf] }
 0x17c   : > { %v1372_v25 = vor.u32 %v1411_v15, %v1369_v2  ;;  %294 = vst [vmem:[#allocation2 + $0x10] sm:$0xcc] %v289_v3  ;;  %961 = vperm.xlu0 %1484, %v958_v18   ;;  %v1324_v50 = vor.u32 %v1399_v60, %v1321_v48  ;;  %v1303_v61 = vld [vmem:[#allocation2 + $0x40] sm:$0xf]  ;;  %v1395_v1 = vld [vmem:[#allocation2 + $0x44] sm:$0xf] }
 0x17d   : > { %v1106_v27 = vsel %vm1104_vm2, %v1368_v19, 0 }
 0x17e   : > { %v1109_v7 = vsel %vm1104_vm2, %v1372_v25, 0  ;;  %v283_v11 = vpop.permute.xlu1 %282  ;;  %1118 = vmatpush.bf16.msra.mxu0 %v1106_v27 }
 0x17f   : > { %1131 = vmatpush.bf16.msra.mxu1 %v1109_v7  ;;  %v334_v23 = vpop.permute.xlu0 %333  ;;  %v286_v20 = vrot.slane %v283_v11, 4  ;;  %1148 = vmatpush.bf16.msra.mxu2 %v1312_v41 }
 0x180   : > { %1161 = vmatpush.bf16.msra.mxu3 %v1316_v43  ;;  %v339_v24 = vrot.slane %v334_v23, 4 }
 0x181   : > { %v290_v31 = vsel %vm231_vm1, %v285_v54, %v286_v20 }
 0x182   : > { %v342_v40 = vsel %vm231_vm1, %v339_v24, %v340_v39  ;;  %v291_v42 = vsel %vm288_vm3, %v281_v33, %v290_v31  ;;  %1119 = vmatpush.bf16.msra.mxu0 %v1352_v16  ;;  %v1319_v39 = vld [vmem:[#allocation2 + $0x60] sm:$0xf]  ;;  %v1279_v33 = vld [vmem:[#allocation2 + $0x8] sm:$0xf]  ;;  %v1397_v12 = vld [vmem:[#allocation2 + $0x4c] sm:$0xf0] }
 0x183   : > { %1132 = vmatpush.bf16.msra.mxu1 %v1356_v28  ;;  %v344_v30 = vsel %vm343_vm4, %v334_v23, %v342_v40  ;;  %295 = vst [vmem:[#allocation2 + $0x18] sm:$0xcc] %v291_v42  ;;  %1149 = vmatpush.bf16.msra.mxu2 %v1296_v63  ;;  %v1320_v38 = vor.u32 %v1401_v56, %v1319_v39  ;;  %v1305_v54 = vld [vmem:[#allocation2 + $0x50] sm:$0xf0]  ;;  %v1389_v25 = vld [vmem:[#allocation2 + $0xc] sm:$0xf0] }
 0x184   : > { %1162 = vmatpush.bf16.msra.mxu3 %v1300_v35  ;;  %349 = vst [vmem:[#allocation2 + $0x20] sm:$0xcc] %v344_v30  ;;  %v1304_v17 = vor.u32 %v1397_v12, %v1303_v61  ;;  %v1308_v59 = vor.u32 %v1395_v1, %v1305_v54  ;;  %v1273_v5 = vld [vmem:[#allocation2 + $0x10] sm:$0xf0]  ;;  %v1272_v27 = vor.u32 %v1389_v25, %v1271_v6 }
 0x185   : > { %v1276_v7 = vor.u32 %v1387_v0, %v1273_v5 }
 0x186   : > { %v361_v8 = vpop.permute.xlu1 %360  ;;  %1120 = vmatpush.bf16.msra.mxu0 %v1336_v47 }
 0x187   : > { %1133 = vmatpush.bf16.msra.mxu1 %v1340_v44  ;;  %v366_v32 = vrot.slane %v361_v8, 4 }
 0x189   : > { %v369_v52 = vsel %vm231_vm1, %v366_v32, %v367_v51 }
 0x18a   : > { %v371_v36 = vsel %vm370_vm5, %v361_v8, %v369_v52  ;;  %1121 = vmatpush.bf16.msra.mxu0 %v1320_v38  ;;  %v1390_v53 = vld [vmem:[#allocation2 + $0x14] sm:$0xf0]  ;;  %v1281_v57 = vld [vmem:[#allocation2 + $0x18] sm:$0xf0] }
 0x18b   : > { %1134 = vmatpush.bf16.msra.mxu1 %v1324_v50  ;;  %376 = vst [vmem:[#allocation2 + $0x30] sm:$0x33] %v371_v36  ;;  %v1280_v58 = vor.u32 %v1390_v53, %v1279_v33  ;;  %v1284_v10 = vor.u32 %v1388_v55, %v1281_v57  ;;  %v1287_v51 = vld [vmem:[#allocation2 + $0x20] sm:$0xf]  ;;  %v1391_v15 = vld [vmem:[#allocation2 + $0x24] sm:$0xf] }
 0x18d   : > { %1150 = vmatpush.bf16.msra.mxu2 %v1280_v58  ;;  %1163 = vmatpush.bf16.msra.mxu3 %v1284_v10 }
 0x18e   : > { %1122 = vmatpush.bf16.msra.mxu0 %v1304_v17 }
 0x18f   : > { %1135 = vmatpush.bf16.msra.mxu1 %v1308_v59 }
 0x190   : > { %1383 = vmatmul.msk.bf16.vlgmr.msra.gmra.mxu2 %vm343_vm4, %v929_v49  ;;  %1384 = vmatmul.msk.bf16.vlgmr.msra.gmra.mxu3 %vm343_vm4, %v929_v49 }
 0x192   : > { %v1393_v62 = vld [vmem:[#allocation2 + $0x2c] sm:$0xf0]  ;;  %v1289_v2 = vld [vmem:[#allocation2 + $0x30] sm:$0xf0] }
 0x193   : > { %v1288_v3 = vor.u32 %v1393_v62, %v1287_v51  ;;  %v1292_v19 = vor.u32 %v1391_v15, %v1289_v2 }
 0x195   : > { %1123 = vmatpush.bf16.msra.mxu0 %v1288_v3  ;;  %1136 = vmatpush.bf16.msra.mxu1 %v1292_v19 }
 0x199   : > { %1124 = vmatpush.bf16.msra.mxu0 %v1272_v27  ;;  %1137 = vmatpush.bf16.msra.mxu1 %v1276_v7 }
 0x19c   : > { %1381 = vmatmul.msk.bf16.vlgmr.msra.gmra.mxu0 %vm343_vm4, %v929_v49  ;;  %1382 = vmatmul.msk.bf16.vlgmr.msra.gmra.mxu1 %vm343_vm4, %v929_v49 }
 0x1ee   : > { %v962_v41 = vpop.permute.xlu0 %961 }
 0x213   : > { %v1152_v43 = vpop.f32.mrf.mxu2  ;;  %v1165_v21 = vpop.f32.mrf.mxu3 }
 0x214   : > { %v1153_v9 = vadd.f32 %v1152_v43, %v962_v41  ;;  %v1166_v18 = vadd.f32 %v1165_v21, %v962_v41 }
 0x216   : > { %1171 = vst [vmem:[%s192_s23 + $0x10] sm:$0xff] %v1153_v9 }
 0x217   : > { %1172 = vst [vmem:[%s192_s23 + $0x18] sm:$0xff] %v1166_v18 }
 0x219   : > { %v1126_v11 = vpop.f32.mrf.mxu0  ;;  %v1139_v13 = vpop.f32.mrf.mxu1 }
 0x21a   : > { %v1127_v14 = vadd.f32 %v1126_v11, %v962_v41  ;;  %v1140_v23 = vadd.f32 %v1139_v13, %v962_v41 }
 0x21b   : > { %v1154_v20 = vpop.f32.mrf.mxu2  ;;  %v1167_v22 = vpop.f32.mrf.mxu3 }
 0x21c   : > { %1169 = vst [vmem:[%s192_s23] sm:$0xff] %v1127_v14 }
 0x21d   : > { %1170 = vst [vmem:[%s192_s23 + $0x8] sm:$0xff] %v1140_v23 }
 0x221   : > { %v1128_v26 = vpop.f32.mrf.mxu0  ;;  %v1141_v24 = vpop.f32.mrf.mxu1 }
 0x222 PF: > { %s13_s16 = sadd.s32 1, %s1523_s16   ;;  %s1952_s12 = smov %s1515_s14 }
 0x223   : > { %p10_p7 = scmp.ge.s32.totalorder %s13_s16, 24   ;;  %s1953_s13 = smov %s1519_s15 }
 0x224   : > { %s1954_s14 = smov %s1957_s17  ;;  %s1955_s15 = smov %s1961_s18 }
 0x225   :  { %12 = sbr.rel (!%p10_p7) target bundleno = 3 (0x3), region = 102 }

</bundles_post_ra>
